<compile_context>
chip_gen: v7x
topology: tpu7x:2x2x1
jax: 0.10.0
libtpu: 0.0.40
codegen_flags: <defaults>
</compile_context>

<pallas_src>
import functools
import math

import jax
import jax.numpy as jnp
from jax.experimental import pallas as pl
from jax.experimental.pallas import tpu as pltpu


def _round_up(x, m):
    return ((x + m - 1) // m) * m


def _cdiv(a, b):
    return (a + b - 1) // b


# ----------------------------------------------------------------------------
# Fused kernel: avg-pool (MXU) + subj*obj*visual + tanh + relation predictor
# ----------------------------------------------------------------------------
def _motif_fused_kernel(vis_ref,      # (TM, D*HW) union feats, free NCHW reshape
                        pair_ref,     # (TM, D)   f32  subj_rep*obj_rep (gathered)
                        pool_ref,     # (D*HW, D) one-hot pooling matrix (resident)
                        w_ref,        # (D, Rp)   bf16 predictor weight (resident)
                        b_ref,        # (1, Rp)   f32  predictor bias   (resident)
                        prod_ref,     # (TM, D)   f32  edge_prod_rep out
                        logits_ref,   # (TM, Rp)  f32  class_logits out
                        *, inv_hw, use_tanh):
    # AdaptiveAvgPool2d(1): pooled[m, d] = (1/HW) * sum_h vis[m, d*HW + h]
    # done as an MXU matmul (f32 accumulation) against the one-hot matrix so
    # the input stays in its native lane-dense layout (no transpose, no
    # cross-lane reduce on the critical path).
    pooled = jnp.dot(vis_ref[...], pool_ref[...],
                     preferred_element_type=jnp.float32) * inv_hw          # (TM, D)

    # edge_prod_rep = tanh(subj_rep * obj_rep * visual)   (f32 on VPU/EUP)
    prod = pair_ref[...] * pooled
    if use_tanh:
        prod = jnp.tanh(prod)
    prod_ref[...] = prod.astype(prod_ref.dtype)

    # relation predictor: bf16 MXU operands, f32 accumulation, lane-dense Rp
    logits = jnp.dot(prod.astype(w_ref.dtype), w_ref[...],
                     preferred_element_type=jnp.float32) + b_ref[...]
    logits_ref[...] = logits.astype(logits_ref.dtype)


def _plan_tiles(mp, dhw, d, rp, vis_bytes, budget_bytes=16 << 20):
    """Pick TM and a matching scoped-VMEM limit.

    Budget (16 MiB) keeps the double-buffered working set under v5e's default
    scoped limit; the explicit vmem_limit_bytes we return makes the compiler
    agree with the plan on every generation.
    """
    # resident tensors (conservatively counted double-buffered)
    fixed = 2 * (dhw * d * vis_bytes) + 2 * (d * rp * 2 + rp * 4)
    tm = 256
    while tm > 8:
        per_tile = (2 * tm * dhw * vis_bytes            # vis tile (dbl-buffered)
                    + 2 * tm * d * 4                    # pair tile
                    + 2 * (tm * d * 4 + tm * rp * 4))   # outputs
        if fixed + per_tile <= budget_bytes:
            break
        tm //= 2
    tm = max(tm, 8)
    # keep >= ~4 grid steps so v7x's two TensorCores both get work and the
    # DMA pipeline has something to overlap
    tm = min(tm, max(8, _round_up(_cdiv(mp, 4), 8)))
    tm = min(tm, mp)
    per_tile = (2 * tm * dhw * vis_bytes + 2 * tm * d * 4
                + 2 * (tm * d * 4 + tm * rp * 4))
    vmem_bytes = int(fixed + per_tile + (4 << 20))      # + headroom
    return tm, vmem_bytes


# ----------------------------------------------------------------------------
# NeuralMotif forward (inference path: mode != 'predcls',
# EDGE_LSTM_NUM_LAYERS > 0, USE_TANH = True, USE_ONLINE_OBJ_LABELS = False)
# ----------------------------------------------------------------------------
def neural_motif_forward(params, edge_ctx, x_union_nchw, rel_inds,
                         obj_prob_dists, proposal_labels, *, use_tanh=True):
    """
    edge_ctx        : (N_obj, hidden_dim)       context-encoder output
    x_union_nchw    : (M, D, H, W)              union-box features (pre avg-pool),
                                                bf16 recommended (dtype kept as-is)
    rel_inds        : (M, 2) int32              subject / object indices
    obj_prob_dists  : (N_obj, num_classes)      passed through
    proposal_labels : (N_obj,) int32            proposals' 'labels' field
    """
    D = params["obj_feat_dim"]
    M, C, H, W = x_union_nchw.shape
    assert C == D
    HW = H * W
    DHW = D * HW
    N = edge_ctx.shape[0]
    R = params["pred_w"].shape[1]
    Rp = _round_up(R, 128)                    # lane-dense logits width

    # TODO(synk): pred_feature_extractor (ROIAlign + head), the LSTM context
    # encoder and vocab-file loading are external sub-modules; their outputs
    # are taken as inputs here.

    # post_lstm_fc + subj/obj row gather: tiny (N/M x D) work left to XLA
    # (cheaper than a dedicated pallas_call or an in-kernel row loop).
    edge_rep = edge_ctx @ params["post_lstm_w"] + params["post_lstm_b"]
    edge_rep = edge_rep.reshape(N, 2, D)
    subj_rep = edge_rep[:, 0]
    obj_rep = edge_rep[:, 1]
    pair = subj_rep[rel_inds[:, 0]] * obj_rep[rel_inds[:, 1]]          # (M, D) f32

    # union features: FREE reshape of NCHW to (M, D*HW) — no materialized
    # transpose; keep the incoming dtype (bf16 halves DMA on this tensor).
    vis_dtype = x_union_nchw.dtype
    vis2d = x_union_nchw.reshape(M, DHW)

    # pad the relation axis only to a sublane multiple (8), not to TM
    Mp = _round_up(max(M, 8), 8)
    pad = Mp - M
    if pad:
        vis2d = jnp.pad(vis2d, ((0, pad), (0, 0)))
        pair = jnp.pad(pair, ((0, pad), (0, 0)))

    vis_bytes = jnp.dtype(vis_dtype).itemsize
    TM, vmem_bytes = _plan_tiles(Mp, DHW, D, Rp, vis_bytes)
    grid = pl.cdiv(Mp, TM)

    # one-hot average-pool matrix: pool[d*HW + h, d] = 1  (scaled by 1/HW
    # in-kernel in f32 so non-power-of-two HW stays exact).
    r = jnp.arange(DHW, dtype=jnp.int32)
    pool_mat = (r[:, None] // HW ==
                jnp.arange(D, dtype=jnp.int32)[None, :]).astype(vis_dtype)

    # lane-dense predictor weights (bf16 MXU operands, f32 accumulation), f32 bias
    w_p = jnp.zeros((D, Rp), jnp.bfloat16).at[:, :R].set(
        params["pred_w"].astype(jnp.bfloat16))
    b_p = jnp.zeros((1, Rp), jnp.float32).at[:, :R].set(
        params["pred_b"].astype(jnp.float32))

    kernel = functools.partial(_motif_fused_kernel, inv_hw=1.0 / HW,
                               use_tanh=use_tanh)
    cost = pl.CostEstimate(
        flops=2 * Mp * DHW * D + 2 * Mp * D * Rp + 3 * Mp * D,
        transcendentals=Mp * D if use_tanh else 0,
        bytes_accessed=(Mp * DHW * vis_bytes + Mp * D * 4
                        + DHW * D * vis_bytes + D * Rp * 2 + Rp * 4
                        + Mp * D * 4 + Mp * Rp * 4))

    prod_p, logits_p = pl.pallas_call(
        kernel,
        out_shape=(jax.ShapeDtypeStruct((Mp, D), jnp.float32),
                   jax.ShapeDtypeStruct((Mp, Rp), jnp.float32)),
        grid_spec=pltpu.PrefetchScalarGridSpec(
            num_scalar_prefetch=0,
            grid=(grid,),
            in_specs=[
                pl.BlockSpec((TM, DHW), lambda i: (i, 0)),   # union feats tile
                pl.BlockSpec((TM, D), lambda i: (i, 0)),     # subj*obj pair rep
                pl.BlockSpec((DHW, D), lambda i: (0, 0)),    # pooling one-hot
                pl.BlockSpec((D, Rp), lambda i: (0, 0)),     # predictor W
                pl.BlockSpec((1, Rp), lambda i: (0, 0)),     # predictor b
            ],
            out_specs=(pl.BlockSpec((TM, D), lambda i: (i, 0)),
                       pl.BlockSpec((TM, Rp), lambda i: (i, 0))),
        ),
        compiler_params=pltpu.CompilerParams(
            dimension_semantics=("parallel",),
            vmem_limit_bytes=vmem_bytes),
        cost_estimate=cost,
    )(vis2d, pair, pool_mat, w_p, b_p)

    edge_prod_rep = prod_p[:M]
    class_logits = logits_p[:M, :R]

    # use_online_obj_labels is False -> obj_preds come from proposals' labels
    obj_preds = proposal_labels
    return edge_prod_rep, obj_prob_dists, class_logits, obj_preds, rel_inds


# ----------------------------------------------------------------------------
# Deterministic parameter / input construction and smoke test
# ----------------------------------------------------------------------------
def make_params(key, hidden_dim, obj_feat_dim, num_rels):
    k1, k2, k3 = jax.random.split(key, 3)
    # post_lstm_fc: weight ~ N(0, 10*sqrt(1/hidden_dim)), bias = 0 (module init)
    std = 10.0 * math.sqrt(1.0 / hidden_dim)
    post_lstm_w = jax.random.normal(k1, (hidden_dim, 2 * obj_feat_dim),
                                    jnp.float32) * std        # stored (in, out)
    post_lstm_b = jnp.zeros((1, 2 * obj_feat_dim), jnp.float32)
    # relation predictor ~ Linear(obj_feat_dim, num_rels)
    pred_w = jax.random.normal(k2, (obj_feat_dim, num_rels), jnp.float32) * 0.01
    pred_b = jax.random.normal(k3, (1, num_rels), jnp.float32) * 0.01
    return {
        "obj_feat_dim": obj_feat_dim,
        "post_lstm_w": post_lstm_w,
        "post_lstm_b": post_lstm_b,
        "pred_w": pred_w,
        "pred_b": pred_b,
    }


if __name__ == "__main__":
    # small, module-consistent shapes (M deliberately NOT a multiple of 8)
    N_OBJ = 16          # number of object proposals
    M = 20              # number of relation pairs
    HIDDEN = 32         # NEURAL_MOTIF.HIDDEN_DIM
    D = 128             # obj_feat_dim (feature extractor out_channels)
    NUM_RELS = 64
    NUM_CLASSES = 16
    HSP = WSP = 8       # spatial size of union features before avg-pool

    key = jax.random.PRNGKey(0)
    kp, k1, k2, k3, k4, k5 = jax.random.split(key, 6)

    params = make_params(kp, HIDDEN, D, NUM_RELS)

    edge_ctx = jax.random.normal(k1, (N_OBJ, HIDDEN), jnp.float32)
    # union features carried in bf16 (feature-extractor output dtype choice)
    x_union = jax.random.normal(
        k2, (M, D, HSP, WSP), jnp.float32).astype(jnp.bfloat16)          # NCHW
    rel_inds = jax.random.randint(k3, (M, 2), 0, N_OBJ, jnp.int32)
    obj_prob_dists = jax.nn.softmax(
        jax.random.normal(k4, (N_OBJ, NUM_CLASSES), jnp.float32), axis=-1)
    proposal_labels = jax.random.randint(k5, (N_OBJ,), 0, NUM_CLASSES, jnp.int32)

    outs = neural_motif_forward(params, edge_ctx, x_union, rel_inds,
                                obj_prob_dists, proposal_labels)
    outs = jax.block_until_ready(outs)

    edge_prod_rep, prob_dists, class_logits, obj_preds, rel_inds_out = outs
    assert edge_prod_rep.shape == (M, D)
    assert class_logits.shape == (M, NUM_RELS)
    assert prob_dists.shape == (N_OBJ, NUM_CLASSES)
    assert obj_preds.shape == (N_OBJ,)
    assert rel_inds_out.shape == (M, 2)

    # reference check in plain JAX (same bf16 union features, f32 math)
    xf = x_union.astype(jnp.float32)
    er = edge_ctx @ params["post_lstm_w"] + params["post_lstm_b"]
    er = er.reshape(N_OBJ, 2, D)
    vis = jnp.mean(xf.reshape(M, D, -1), axis=-1)
    ref_prod = jnp.tanh(er[:, 0][rel_inds[:, 0]] * er[:, 1][rel_inds[:, 1]] * vis)
    ref_logits_bf16 = jnp.dot(ref_prod.astype(jnp.bfloat16),
                              params["pred_w"].astype(jnp.bfloat16),
                              preferred_element_type=jnp.float32) + params["pred_b"]
    ref_logits_f32 = ref_prod @ params["pred_w"] + params["pred_b"]

    assert jnp.allclose(edge_prod_rep, ref_prod, atol=2e-3, rtol=2e-3)
    assert jnp.allclose(class_logits, ref_logits_bf16, atol=2e-2, rtol=2e-2)
    assert jnp.allclose(class_logits, ref_logits_f32, atol=5e-2, rtol=5e-2)

    print("KERNEL_OK")
</pallas_src>

<mosaic_0001>
module attributes {stable_mosaic.version = 11 : i64} {
  func.func @_motif_fused_kernel(%arg0: i32, %arg1: memref<8x8192xbf16, #tpu.memory_space<vmem>>, %arg2: memref<8x128xf32, #tpu.memory_space<vmem>>, %arg3: memref<8192x128xbf16, #tpu.memory_space<vmem>>, %arg4: memref<128x128xbf16, #tpu.memory_space<vmem>>, %arg5: memref<1x128xf32, #tpu.memory_space<vmem>>, %arg6: memref<8x128xf32, #tpu.memory_space<vmem>>, %arg7: memref<8x128xf32, #tpu.memory_space<vmem>>) attributes {dimension_semantics = [#tpu.dimension_semantics<parallel>], iteration_bounds = array<i64: 3>, scalar_prefetch = 0 : i64, scratch_operands = 0 : i64, tpu.core_type = #tpu.core_type<tc>, window_params = [{transform_indices = @transform_0, window_bounds = array<i64: 8, 8192>}, {transform_indices = @transform_1, window_bounds = array<i64: 8, 128>}, {pipeline_mode = #tpu.pipeline_mode<synchronous>, transform_indices = @transform_2, window_bounds = array<i64: 8192, 128>}, {pipeline_mode = #tpu.pipeline_mode<synchronous>, transform_indices = @transform_3, window_bounds = array<i64: 128, 128>}, {pipeline_mode = #tpu.pipeline_mode<synchronous>, transform_indices = @transform_4, window_bounds = array<i64: 1, 128>}, {transform_indices = @transform_5, window_bounds = array<i64: 8, 128>}, {transform_indices = @transform_6, window_bounds = array<i64: 8, 128>}]} {
    %c0 = arith.constant 0 : index
    %c0_0 = arith.constant 0 : index
    %0 = vector.load %arg1[%c0, %c0_0] : memref<8x8192xbf16, #tpu.memory_space<vmem>>, vector<8x8192xbf16>
    %c0_1 = arith.constant 0 : index
    %c0_2 = arith.constant 0 : index
    %1 = vector.load %arg3[%c0_1, %c0_2] : memref<8192x128xbf16, #tpu.memory_space<vmem>>, vector<8192x128xbf16>
    %cst = arith.constant dense<0.000000e+00> : vector<8x128xf32>
    %2 = tpu.matmul %0, %1, %cst {dimension_numbers = #tpu.dot_dimension_numbers<[1], [0], [0], [1], [0, 0, 1, 1], [], []>} : vector<8x8192xbf16>, vector<8192x128xbf16>, vector<8x128xf32> -> vector<8x128xf32>
    %cst_3 = arith.constant 1.562500e-02 : f32
    %3 = vector.broadcast %cst_3 : f32 to vector<8x128xf32>
    %4 = arith.mulf %2, %3 : vector<8x128xf32>
    %c0_4 = arith.constant 0 : index
    %c0_5 = arith.constant 0 : index
    %5 = vector.load %arg2[%c0_4, %c0_5] : memref<8x128xf32, #tpu.memory_space<vmem>>, vector<8x128xf32>
    %6 = arith.mulf %5, %4 : vector<8x128xf32>
    %7 = math.tanh %6 : vector<8x128xf32>
    %c0_6 = arith.constant 0 : index
    %c0_7 = arith.constant 0 : index
    %8 = vector.load %arg6[%c0_6, %c0_7] : memref<8x128xf32, #tpu.memory_space<vmem>>, vector<8x128xf32>
    tpu.vector_store %arg6[%c0_6, %c0_7], %7 {strides = array<i32>} : memref<8x128xf32, #tpu.memory_space<vmem>>, vector<8x128xf32>,
    %9 = arith.truncf %7 : vector<8x128xf32> to vector<8x128xbf16>
    %c0_8 = arith.constant 0 : index
    %c0_9 = arith.constant 0 : index
    %10 = vector.load %arg4[%c0_8, %c0_9] : memref<128x128xbf16, #tpu.memory_space<vmem>>, vector<128x128xbf16>
    %cst_10 = arith.constant dense<0.000000e+00> : vector<8x128xf32>
    %11 = tpu.matmul %9, %10, %cst_10 {dimension_numbers = #tpu.dot_dimension_numbers<[1], [0], [0], [1], [0, 0, 1, 1], [], []>} : vector<8x128xbf16>, vector<128x128xbf16>, vector<8x128xf32> -> vector<8x128xf32>
    %c0_11 = arith.constant 0 : index
    %c0_12 = arith.constant 0 : index
    %12 = vector.load %arg5[%c0_11, %c0_12] : memref<1x128xf32, #tpu.memory_space<vmem>>, vector<1x128xf32>
    %13 = vector.broadcast %12 : vector<1x128xf32> to vector<8x128xf32>
    %14 = arith.addf %11, %13 : vector<8x128xf32>
    %c0_13 = arith.constant 0 : index
    %c0_14 = arith.constant 0 : index
    %15 = vector.load %arg7[%c0_13, %c0_14] : memref<8x128xf32, #tpu.memory_space<vmem>>, vector<8x128xf32>
    tpu.vector_store %arg7[%c0_13, %c0_14], %14 {strides = array<i32>} : memref<8x128xf32, #tpu.memory_space<vmem>>, vector<8x128xf32>,
    return
  }
  func.func @transform_0(%arg0: i32) -> (i32, i32) {
    %c0_i32 = arith.constant 0 : i32
    %c0_i32_0 = arith.constant 0 : i32
    return %arg0, %c0_i32 : i32, i32
  }
  func.func @transform_1(%arg0: i32) -> (i32, i32) {
    %c0_i32 = arith.constant 0 : i32
    %c0_i32_0 = arith.constant 0 : i32
    return %arg0, %c0_i32 : i32, i32
  }
  func.func @transform_2(%arg0: i32) -> (i32, i32) {
    %c0_i32 = arith.constant 0 : i32
    %c0_i32_0 = arith.constant 0 : i32
    %c0_i32_1 = arith.constant 0 : i32
    return %c0_i32, %c0_i32_0 : i32, i32
  }
  func.func @transform_3(%arg0: i32) -> (i32, i32) {
    %c0_i32 = arith.constant 0 : i32
    %c0_i32_0 = arith.constant 0 : i32
    %c0_i32_1 = arith.constant 0 : i32
    return %c0_i32, %c0_i32_0 : i32, i32
  }
  func.func @transform_4(%arg0: i32) -> (i32, i32) {
    %c0_i32 = arith.constant 0 : i32
    %c0_i32_0 = arith.constant 0 : i32
    %c0_i32_1 = arith.constant 0 : i32
    return %c0_i32, %c0_i32_0 : i32, i32
  }
  func.func @transform_5(%arg0: i32) -> (i32, i32) {
    %c0_i32 = arith.constant 0 : i32
    %c0_i32_0 = arith.constant 0 : i32
    return %arg0, %c0_i32 : i32, i32
  }
  func.func @transform_6(%arg0: i32) -> (i32, i32) {
    %c0_i32 = arith.constant 0 : i32
    %c0_i32_0 = arith.constant 0 : i32
    return %arg0, %c0_i32 : i32, i32
  }
}

</mosaic_0001>

<bundles_post_ra>
// kernel: tpu_custom_call.1
= control target key start
LH: loop header
LB: loop body
LE: loop exit
PB: predicated region body
PF: predicated region fallthrough
CT: control target
= control target key end

     0   :  { %s8999_s0 = inlined_call_operand.hbm [shape: bf16[24,8192], index: 0, kind: input, shape index: {}]   ;;  %s9000_s1 = inlined_call_operand.hbm [shape: f32[24,128], index: 1, kind: input, shape index: {}]   ;;  %s9001_s2 = inlined_call_operand.hbm [shape: bf16[8192,128], index: 2, kind: input, shape index: {}]   ;;  %s9002_s3 = inlined_call_operand.hbm [shape: bf16[128,128], index: 3, kind: input, shape index: {}]   ;;  %s9003_s4 = inlined_call_operand.hbm [shape: f32[1,128], index: 4, kind: input, shape index: {}]   ;;  %s9004_s5 = inlined_call_operand.hbm [shape: f32[24,128], index: 5, kind: output, shape index: {0}]   ;;  %s9005_s6 = inlined_call_operand.hbm [shape: f32[24,128], index: 6, kind: output, shape index: {1}]  }
   0x1   :  { %9010 = sst [smem:[#allocation20_spill]] %s8999_s0 }
   0x2   :  { %9011 = sst [smem:[#allocation21_spill]] %s9001_s2 }
   0x3   :  { %12 = vsyncpa [#allocation3], 0 }
   0x4   :  { %14 = vsyncpa [#allocation3 + $0x1], 0 }
   0x5   :  { %15 = vsyncpa [#allocation6], 0 }
   0x6   :  { %17 = vsyncpa [#allocation6 + $0x1], 0 }
   0x7   :  { %18 = vsyncpa [#allocation9], 0 }
   0x8   :  { %19 = vsyncpa [#allocation4], 0 }
   0x9   :  { %21 = vsyncpa [#allocation4 + $0x1], 0 }
   0xa   :  { %22 = vsyncpa [#allocation13], 0 }
   0xb   :  { %24 = vsyncpa [#allocation13 + $0x1], 0  ;;  %s8616_s21 = smov 0   ;;  %s8618_s22 = smov 0  }
   0xc   :  { %s8620_s23 = smov 0   ;;  %s8622_s24 = smov 0  }
   0xd LB: > { %s8637_s25 = sadd.s32 4294967295, %s8568_s24   ;;  %s6293_s26 = sadd.s32 4294967294, %s8568_s24   ;;  %s8568_s24 = sphi %s8622_s24, %s9034_s24   ;;  %s8564_s23 = sphi %s8620_s23, %s9033_s23   ;;  %s8560_s22 = sphi %s8618_s22, %s9032_s22   ;;  %s8556_s21 = sphi %s8616_s21, %s9031_s21  }
   0xe   : > { %p50_p0 = scmp.ne.s32.totalorder %s8560_s22, %s8556_s21  ;;  %p9006_p1 = scmp.eq.s32.totalorder %s8637_s25, 0 }
   0xf   : > { %p169_p3 = scmp.eq.s32.totalorder %s6293_s26, 2  ;;  %p6294_p5 = scmp.ge.s32.totalorder %s8568_s24, 1 }
  0x10   : > { %p8646_p4 = por %p9006_p1, %p50_p0  ;;  %p202_p7 = scmp.lt.s32.totalorder %s8568_s24, 4 }
  0x11   : > { %p8651_p6 = por %p169_p3, %p50_p0  ;;  %s8570_s30 = smov [#allocation7]  }
  0x12   : > { %s9012_s27 = scalar_select %p8646_p4, 1, 0 }
  0x13   : > { %s9013_s28 = scalar_select %p8651_p6, 1, 0 }
  0x14   : > { %p8656_p8 = pnand %p6294_p5, %p202_p7  ;;  %s214_s7 = sshll.u32 %s8570_s30, 4  ;;  %s8660_s7 = int_to_ptr.vmem [resolvable:$true] %s214_s7 }
  0x15   : > { %s8571_s9 = smov [#allocation8]   ;;  %s8572_s11 = smov [#allocation10]  }
  0x16   : > { %s9014_s29 = scalar_select %p8656_p8, 1, 0 }
  0x17   : > { %p7657_p9 = pneg %p8656_p8  ;;  %s227_s10 = sshll.u32 %s8571_s9, 4  ;;  %s8670_s10 = int_to_ptr.vmem [resolvable:$true] %s227_s10 }
  0x18   : > { %s8672_s12 = sshll.u32 %s8572_s11, 4  ;;  %s9016_s2 = sld [smem:[#allocation21_spill]]  ;;  %s242_s12 = int_to_ptr.vmem [resolvable:$true] %s8672_s12 }
  0x19   : > { %p8666_p10 = pnand %p7657_p9, %p9006_p1 }
  0x1b   : > { %p8682_p12 = pneg %p8666_p10 }
  0x1e   : > { %s8314_s15 = scalar_lea.hbm %s9016_s2, 65536 }
  0x1f   : > { %p8315_p11 = scmp.ne.s32.totalorder %s9016_s2, %s8314_s15  ;;  %p8321_p3 = scmp.lt.u32.totalorder %s8314_s15, %s9016_s2 }
  0x21   : > { %p8317_p13 = pnand %p8682_p12, %p8315_p11 }
  0x23   : > { %p8318_p0 = pneg %p8317_p13 }
  0x25   : > { %p8323_p5 = pnand %p8321_p3, %p8318_p0 }
  0x27   : > { %8326 = shalt.err (!%p8323_p5)
}
  0x28   : > { %s8327_s26 = scalar_lea.vmem %s8660_s7, 65536  ;;  %p8335_p2 = scmp.lt.s32.totalorder %s8660_s7, %s8660_s7 }
  0x29   : > { %p8328_p7 = scmp.ne.s32.totalorder %s8660_s7, %s8327_s26  ;;  %p8336_p6 = scmp.lt.s32.totalorder %s8327_s26, %s8327_s26 }
  0x2b   : > { %p8330_p9 = pnand %p8328_p7, %p8682_p12  ;;  %p8337_p11 = por %p8336_p6, %p8335_p2 }
  0x2d   : > { %p8331_p1 = pneg %p8330_p9 }
  0x2f   : > { %p8338_p13 = pnand %p8337_p11, %p8331_p1 }
  0x31   : > { %8341 = shalt.err (!%p8338_p13)
}
  0x32   : > { %s8573_s30 = smov 64   ;;  %s8574_s9 = smov 4  }
  0x33   : > { %7660 = dma.hbm_to_vmem [thread:$0]  (!%p8666_p10), %s9016_s2, 65536, %s8660_s7, [#allocation6], %s8573_s30, %s8573_s30, %s8574_s9  }
  0x34   : > { %s8342_s16 = scalar_lea.hbm %s9002_s3, 1024 }
  0x35   : > { %p8343_p2 = scmp.ne.s32.totalorder %s9002_s3, %s8342_s16  ;;  %p8349_p0 = scmp.lt.u32.totalorder %s8342_s16, %s9002_s3 }
  0x37   : > { %p8345_p1 = pnand %p8343_p2, %p8682_p12 }
  0x39   : > { %p8346_p6 = pneg %p8345_p1 }
  0x3b   : > { %p8351_p3 = pnand %p8349_p0, %p8346_p6 }
  0x3d   : > { %8354 = shalt.err (!%p8351_p3)
}
  0x3e   : > { %s8355_s7 = scalar_lea.vmem %s8670_s10, 1024  ;;  %p8363_p11 = scmp.lt.s32.totalorder %s8670_s10, %s8670_s10 }
  0x3f   : > { %p8356_p5 = scmp.ne.s32.totalorder %s8670_s10, %s8355_s7  ;;  %p8364_p13 = scmp.lt.s32.totalorder %s8355_s7, %s8355_s7 }
  0x41   : > { %p8358_p7 = pnand %p8356_p5, %p8682_p12  ;;  %p8365_p2 = por %p8364_p13, %p8363_p11 }
  0x43   : > { %p8359_p9 = pneg %p8358_p7 }
  0x45   : > { %p8366_p1 = pnand %p8365_p2, %p8359_p9 }
  0x47   : > { %8369 = shalt.err (!%p8366_p1)
}
  0x48   : > { %7663 = dma.hbm_to_vmem [thread:$0]  (!%p8666_p10), %s9002_s3, 1024, %s8670_s10, [#allocation9], %s8573_s30, %s8573_s30, %s8574_s9  }
  0x49   : > { %s8370_s16 = scalar_lea.hbm %s9003_s4, 16 }
  0x4a   : > { %p8371_p6 = scmp.ne.s32.totalorder %s9003_s4, %s8370_s16  ;;  %p8377_p5 = scmp.lt.u32.totalorder %s8370_s16, %s9003_s4 }
  0x4c   : > { %p8373_p0 = pnand %p8371_p6, %p8682_p12 }
  0x4e   : > { %p8374_p3 = pneg %p8373_p0 }
  0x50   : > { %p8379_p7 = pnand %p8377_p5, %p8374_p3 }
  0x52   : > { %8382 = shalt.err (!%p8379_p7)
}
  0x53   : > { %s8383_s7 = scalar_lea.vmem %s242_s12, 16  ;;  %s8390_s10 = scalar_lea.vmem %s242_s12, 32 }
  0x54   : > { %p8384_p9 = scmp.ne.s32.totalorder %s242_s12, %s8383_s7  ;;  %p8391_p2 = scmp.lt.s32.totalorder %s242_s12, %s242_s12 }
  0x55   : > { %p8392_p1 = scmp.lt.s32.totalorder %s8390_s10, %s8383_s7 }
  0x56   : > { %p8386_p11 = pnand %p8384_p9, %p8682_p12 }
  0x57   : > { %p8393_p4 = por %p8392_p1, %p8391_p2 }
  0x58   : > { %p8387_p13 = pneg %p8386_p11 }
  0x5a   : > { %p8394_p8 = pnand %p8393_p4, %p8387_p13 }
  0x5c   : > { %8397 = shalt.err (!%p8394_p8)
}
  0x5d   : > { %7666 = dma.hbm_to_vmem [thread:$0]  (!%p8666_p10), %s9003_s4, 16, %s242_s12, [#allocation9]  }
  0x5e   : > { %s8746_s18 = sadd.s32 1, %s8568_s24   ;;  %s37_s8 = sadd.s32 1, %s8564_s23 }
  0x5f   : > { %s34_s11 = ssub.s32 %s8568_s24, %s8746_s18  ;;  %p44_p8 = scmp.ne.s32.totalorder %s8564_s23, %s8560_s22 }
  0x60   : > { %p35_p4 = scmp.eq.s32.totalorder %s34_s11, 0  ;;  %p45_p12 = scmp.eq.s32.totalorder %s8568_s24, 0 }
  0x61   : > { %p7684_p6 = scmp.lt.s32.totalorder %s8568_s24, 3  ;;  %p9018_p3 = scmp.eq.s32.totalorder %s8637_s25, 2 }
  0x62   : > { %s8756_s13 = scalar_select %p35_p4, %s8564_s23, %s37_s8  }
  0x63   : > { %p46_p0 = por %p45_p12, %p44_p8  ;;  %p8760_p5 = por %p9018_p3, %p44_p8 }
  0x64   : > { %s8765_s15 = sand.u32 1, %s8564_s23   ;;  %s6903_s12 = sshll.u32 %s8568_s24, 12 }
  0x65   : > { %s9019_s14 = scalar_select %p8760_p5, 1, 0 }
  0x66   : > { %s6299_s16 = sshll.u32 %s8765_s15, 8  ;;  %s9020_s0 = sld [smem:[#allocation20_spill]] }
  0x67   : > { %s256_s26 = scalar_lea.vmem [#allocation2], %s6299_s16  ;;  %p8774_p10 = pnand %p7684_p6, %p46_p0 }
  0x68   : > { %s264_s7 = sshll.u32 %s256_s26, 4  ;;  %s253_s9 = scalar_lea.sflag [#allocation3], %s8765_s15  ;;  %s8778_s7 = int_to_ptr.vmem [resolvable:$true] %s264_s7 }
  0x69   : > { %p8400_p9 = pneg %p8774_p10 }
  0x6c   : > { %s8772_s20 = scalar_lea.hbm %s9020_s0, %s6903_s12  ;;  %s8403_s16 = scalar_lea.hbm %s9020_s0, 12288 }
  0x6d   : > { %s8398_s11 = scalar_lea.hbm %s8772_s20, 4096  ;;  %p8404_p2 = scmp.lt.u32.totalorder %s8772_s20, %s9020_s0 }
  0x6e   : > { %p8399_p7 = scmp.ne.s32.totalorder %s8772_s20, %s8398_s11  ;;  %p8405_p1 = scmp.lt.u32.totalorder %s8403_s16, %s8398_s11 }
  0x6f   : > { %p8407_p8 = scmp.lt.u32.totalorder %s8398_s11, %s8772_s20 }
  0x70   : > { %p8401_p11 = pnand %p8400_p9, %p8399_p7  ;;  %p8406_p4 = por %p8405_p1, %p8404_p2 }
  0x72   : > { %p8402_p13 = pneg %p8401_p11  ;;  %p8408_p12 = por %p8407_p8, %p8406_p4 }
  0x74   : > { %p8409_p6 = pnand %p8408_p12, %p8402_p13 }
  0x76   : > { %8412 = shalt.err (!%p8409_p6)
}
  0x77   : > { %s8413_s26 = scalar_lea.vmem %s8778_s7, 4096  ;;  %s8575_s8 = smov [#allocation2]  }
  0x78   : > { %p8414_p0 = scmp.ne.s32.totalorder %s8778_s7, %s8413_s26  ;;  %s8418_s12 = sshll.u32 %s8575_s8, 4  ;;  %s8419_s12 = int_to_ptr.vmem [resolvable:$false] %s8418_s12 }
  0x79   : > { %s8420_s17 = scalar_lea.vmem %s8419_s12, 8192  ;;  %p8421_p11 = scmp.lt.s32.totalorder %s8778_s7, %s8419_s12 }
  0x7a   : > { %p8416_p3 = pnand %p8414_p0, %p8400_p9  ;;  %p8422_p2 = scmp.lt.s32.totalorder %s8420_s17, %s8413_s26 }
  0x7c   : > { %p8417_p7 = pneg %p8416_p3  ;;  %p8423_p1 = por %p8422_p2, %p8421_p11 }
  0x7e   : > { %p8424_p4 = pnand %p8423_p1, %p8417_p7 }
  0x80   : > { %8427 = shalt.err (!%p8424_p4)
}
  0x81   : > { %7670 = dma.hbm_to_vmem [thread:$0]  (!%p8774_p10), %s8772_s20, 4096, %s8778_s7, %s253_s9  }
  0x82   : > { %s6302_s11 = sshll.u32 %s8765_s15, 3  ;;  %s6303_s16 = sshll.u32 %s8568_s24, 7 }
  0x83   : > { %s8812_s30 = scalar_lea.hbm %s9000_s1, %s6303_s16  ;;  %s275_s26 = scalar_lea.vmem [#allocation5], %s6302_s11 }
  0x84   : > { %s282_s12 = sshll.u32 %s275_s26, 4  ;;  %s9022_s17 = sand.u32 1, %s8568_s24   ;;  %s283_s12 = int_to_ptr.vmem [resolvable:$true] %s282_s12 }
  0x85   : > { %s272_s0 = scalar_lea.sflag [#allocation6], %s9022_s17  ;;  %s8428_s2 = scalar_lea.hbm %s8812_s30, 128 }
  0x86   : > { %p8429_p13 = scmp.ne.s32.totalorder %s8812_s30, %s8428_s2  ;;  %s8433_s7 = scalar_lea.hbm %s9000_s1, 384 }
  0x87   : > { %p8434_p6 = scmp.lt.u32.totalorder %s8812_s30, %s9000_s1  ;;  %p8435_p0 = scmp.lt.u32.totalorder %s8433_s7, %s8428_s2 }
  0x88   : > { %p8431_p8 = pnand %p8429_p13, %p8400_p9  ;;  %p8437_p7 = scmp.lt.u32.totalorder %s8428_s2, %s8812_s30 }
  0x89   : > { %p8436_p3 = por %p8435_p0, %p8434_p6 }
  0x8a   : > { %p8432_p12 = pneg %p8431_p8 }
  0x8b   : > { %p8438_p11 = por %p8437_p7, %p8436_p3 }
  0x8d   : > { %p8439_p2 = pnand %p8438_p11, %p8432_p12 }
  0x8f   : > { %8442 = shalt.err (!%p8439_p2)
}
  0x90   : > { %s8443_s11 = scalar_lea.vmem %s283_s12, 128  ;;  %s8576_s19 = smov [#allocation5]  }
  0x91   : > { %p8444_p1 = scmp.ne.s32.totalorder %s283_s12, %s8443_s11  ;;  %s8448_s8 = sshll.u32 %s8576_s19, 4  ;;  %s8449_s8 = int_to_ptr.vmem [resolvable:$false] %s8448_s8 }
  0x92   : > { %s8450_s26 = scalar_lea.vmem %s8449_s8, 256  ;;  %p8451_p8 = scmp.lt.s32.totalorder %s283_s12, %s8449_s8 }
  0x93   : > { %p8446_p4 = pnand %p8444_p1, %p8400_p9  ;;  %p8452_p5 = scmp.lt.s32.totalorder %s8450_s26, %s8443_s11 }
  0x95   : > { %p8447_p13 = pneg %p8446_p4  ;;  %p8453_p0 = por %p8452_p5, %p8451_p8 }
  0x97   : > { %p8454_p6 = pnand %p8453_p0, %p8447_p13 }
  0x99   : > { %8457 = shalt.err (!%p8454_p6)
}
  0x9a   : > { %7673 = dma.hbm_to_vmem [thread:$0]  (!%p8774_p10), %s8812_s30, 128, %s283_s12, %s272_s0  }
  0x9b   : > { %p9023_p12 = scmp.ne.s32.totalorder %s9014_s29, 0 }
  0x9c   : > { %s8838_s2 = sand.u32 (!%p9023_p12), 1, %s8560_s22   ;;  %p9024_p5 = scmp.ne.s32.totalorder (!%p9023_p12), %s9012_s27, 0 }
  0x9d   : > { %291 = sbr.rel (%p9023_p12) target bundleno = 1153 (0x481), region = 40  ;;  %s6305_s17 = sshll.u32 (!%p9023_p12), %s8838_s2, 8 }
  0x9e   : > { %s294_s15 = scalar_lea.sflag (!%p9023_p12), [#allocation3], %s8838_s2  ;;  %s8842_s20 = scalar_lea.vmem (!%p9023_p12), [#allocation2], %s6305_s17 }
  0xa4   : > { %8531 = dma.done.wait (%p9024_p5), %s294_s15, 4096  }
  0xa5   : > { %8533 = vsyncadd (%p9024_p5), %s294_s15, 4294963200  ;;  %s302_s0 = sand.u32 1, %s8637_s25   ;;  %s8850_s29 = sshll.u32 %s8838_s2, 3 }
  0xa6   : > { %s303_s10 = scalar_lea.sflag [#allocation6], %s302_s0  ;;  %s306_s30 = scalar_lea.vmem [#allocation5], %s8850_s29 }
  0xa7   : > { %8535 = dma.done.wait (%p9024_p5), %s303_s10, 128  }
  0xa8   : > { %8537 = vsyncadd (%p9024_p5), %s303_s10, 4294967168  ;;  %p9025_p10 = scmp.eq.s32.totalorder %s8637_s25, 0 }
  0xaa   : > { %8539 = dma.done.wait (%p9025_p10), [#allocation6], 65536   ;;  %p9026_p9 = pmov %p9025_p10 }
  0xac   : > { %8541 = vsyncadd (%p9026_p9), [#allocation6], 4294901760  ;;  %p9027_p3 = pmov %p9026_p9 }
  0xae   : > { %8543 = dma.done.wait (%p9027_p3), [#allocation9], 1040   ;;  %p9028_p7 = pmov %p9027_p3 }
  0xaf   : > { %v7728_v0 = vld [vmem:[#allocation7 + $0x40] sm:$0xff]   ;;  %v7732_v4 = vld [vmem:[#allocation7 + $0x48] sm:$0xff]   ;;  %v7736_v8 = vld [vmem:[#allocation7 + $0x50] sm:$0xff]   ;;  %vm8578_vm0 = vmmov 0   ;;  %s349_s27 = scalar_lea.vmem [#allocation11], %s8850_s29  ;;  %s6899_s12 = sshll.u32 %s8637_s25, 7 }
  0xb0   : > { %8545 = vsyncadd (%p9028_p7), [#allocation9], 4294966256  ;;  %v7729_v1 = vld [vmem:[#allocation7 + $0xc0] sm:$0xff]   ;;  %6904 = vmatprep.subr.bf16.mxu0 %v7728_v0  ;;  %v7733_v5 = vld [vmem:[#allocation7 + $0xc8] sm:$0xff]   ;;  %s8930_s16 = scalar_lea.hbm %s9004_s5, %s6899_s12  ;;  %s6127_s11 = sshll.u32 %s349_s27, 4  ;;  %s6128_s11 = int_to_ptr.vmem [resolvable:$true] %s6127_s11 }
  0xb1   : > { %v7730_v2 = vld [vmem:[#allocation7] sm:$0xff]   ;;  %6926 = vmatprep.subr.bf16.mxu1 %v7729_v1  ;;  %v7734_v6 = vld [vmem:[#allocation7 + $0x8] sm:$0xff]   ;;  %v7737_v9 = vld [vmem:[#allocation7 + $0xd0] sm:$0xff]   ;;  %s6109_s19 = scalar_lea.sflag [#allocation4], %s8838_s2  ;;  %s8458_s8 = scalar_lea.vmem %s6128_s11, 128 }
  0xb2   : > { %v7731_v3 = vld [vmem:[#allocation7 + $0x80] sm:$0xff]   ;;  %6905 = vmatpush3.bf16.msra.mxu0 %v7730_v2  ;;  %v7735_v7 = vld [vmem:[#allocation7 + $0x88] sm:$0xff]   ;;  %v7738_v10 = vld [vmem:[#allocation7 + $0x10] sm:$0xff]   ;;  %p8459_p11 = scmp.ne.s32.totalorder %s6128_s11, %s8458_s8  ;;  %p9029_p2 = scmp.ne.s32.totalorder %s9019_s14, 0 }
  0xb3   : > { %6927 = vmatpush3.bf16.msra.mxu1 %v7731_v3  ;;  %6906 = vmatprep.subr.bf16.mxu0 %v7732_v4  ;;  %v7739_v11 = vld [vmem:[#allocation7 + $0x90] sm:$0xff]   ;;  %v7740_v12 = vld [vmem:[#allocation7 + $0x58] sm:$0xff]   ;;  %v7744_v16 = vld [vmem:[#allocation7 + $0x60] sm:$0xff]   ;;  %s8579_s26 = smov [#allocation11]  }
  0xb4   : > { %6928 = vmatprep.subr.bf16.mxu1 %v7733_v5  ;;  %v7741_v13 = vld [vmem:[#allocation7 + $0xd8] sm:$0xff]   ;;  %v7745_v17 = vld [vmem:[#allocation7 + $0xe0] sm:$0xff]   ;;  %v7748_v20 = vld [vmem:[#allocation7 + $0x68] sm:$0xff]   ;;  %p8460_p1 = pnand %p8459_p11, %p9029_p2  ;;  %s8462_s17 = sshll.u32 %s8579_s26, 4  ;;  %s8463_s17 = int_to_ptr.vmem [resolvable:$false] %s8462_s17 }
  0xb5   : > { %v7742_v14 = vld [vmem:[#allocation7 + $0x18] sm:$0xff]   ;;  %v7746_v18 = vld [vmem:[#allocation7 + $0x20] sm:$0xff]   ;;  %v7749_v21 = vld [vmem:[#allocation7 + $0xe8] sm:$0xff]   ;;  %s8464_s15 = scalar_lea.vmem %s8463_s17, 256  ;;  %p8465_p13 = scmp.lt.s32.totalorder %s6128_s11, %s8463_s17 }
  0xb6   : > { %6907 = vmatpush3.bf16.msra.mxu0 %v7734_v6  ;;  %v7743_v15 = vld [vmem:[#allocation7 + $0x98] sm:$0xff]   ;;  %v7747_v19 = vld [vmem:[#allocation7 + $0xa0] sm:$0xff]   ;;  %v7750_v22 = vld [vmem:[#allocation7 + $0x28] sm:$0xff]   ;;  %p8461_p4 = pneg %p8460_p1  ;;  %p8466_p8 = scmp.lt.s32.totalorder %s8464_s15, %s8458_s8 }
  0xb7   : > { %6929 = vmatpush3.bf16.msra.mxu1 %v7735_v7  ;;  %6908 = vmatprep.subr.bf16.mxu0 %v7736_v8  ;;  %v7751_v23 = vld [vmem:[#allocation7 + $0xa8] sm:$0xff]   ;;  %v7752_v24 = vld [vmem:[#allocation7 + $0x70] sm:$0xff]   ;;  %v7756_v28 = vld [vmem:[#allocation7 + $0x78] sm:$0xff]  }
  0xb8   : > { %6930 = vmatprep.subr.bf16.mxu1 %v7737_v9  ;;  %v7753_v25 = vld [vmem:[#allocation7 + $0xf0] sm:$0xff]   ;;  %v7757_v29 = vld [vmem:[#allocation7 + $0xf8] sm:$0xff]   ;;  %v7764_v38 = vld [vmem:[#allocation7 + $0x140] sm:$0xff]   ;;  %p8467_p0 = por %p8466_p8, %p8465_p13 }
  0xb9   : > { %v7754_v26 = vld [vmem:[#allocation7 + $0x30] sm:$0xff]   ;;  %v7758_v30 = vld [vmem:[#allocation7 + $0x38] sm:$0xff]   ;;  %v7765_v39 = vld [vmem:[#allocation7 + $0x1c0] sm:$0xff]  }
  0xba   : > { %6909 = vmatpush3.bf16.msra.mxu0 %v7738_v10  ;;  %v7755_v27 = vld [vmem:[#allocation7 + $0xb0] sm:$0xff]   ;;  %v7759_v31 = vld [vmem:[#allocation7 + $0xb8] sm:$0xff]   ;;  %v7766_v40 = vld [vmem:[#allocation7 + $0x100] sm:$0xff]   ;;  %p8468_p6 = pnand %p8467_p0, %p8461_p4 }
  0xbb   : > { %6931 = vmatpush3.bf16.msra.mxu1 %v7739_v11  ;;  %6910 = vmatprep.subr.bf16.mxu0 %v7740_v12  ;;  %v358_v32 = vld [vmem:[%s8842_s20] sm:$0xff]  ;;  %v359_v33 = vld [vmem:[%s8842_s20 + $0x8] sm:$0xff]  ;;  %v7767_v41 = vld [vmem:[#allocation7 + $0x180] sm:$0xff]  }
  0xbc   : > { %6932 = vmatprep.subr.bf16.mxu1 %v7741_v13  ;;  %v6312_v34 = vcombine.low %v358_v32, %v358_v32  ;;  %v6313_v35 = vcombine.high %v358_v32, %v358_v32  ;;  %v6314_v36 = vcombine.low %v359_v33, %v359_v33  ;;  %v6315_v37 = vcombine.high %v359_v33, %v359_v33  ;;  %v7768_v42 = vld [vmem:[#allocation7 + $0x148] sm:$0xff]   ;;  %v7772_v46 = vld [vmem:[#allocation7 + $0x150] sm:$0xff]   ;;  %v7776_v50 = vld [vmem:[#allocation7 + $0x158] sm:$0xff]  }
  0xbd   : > { %v7769_v43 = vld [vmem:[#allocation7 + $0x1c8] sm:$0xff]   ;;  %v7773_v47 = vld [vmem:[#allocation7 + $0x1d0] sm:$0xff]   ;;  %v7777_v51 = vld [vmem:[#allocation7 + $0x1d8] sm:$0xff]  }
  0xbe   : > { %6911 = vmatpush3.bf16.msra.mxu0 %v7742_v14  ;;  %4742 = vmatprep.mubr.bf16.mxu0 %v6313_v35  ;;  %v7770_v44 = vld [vmem:[#allocation7 + $0x108] sm:$0xff]   ;;  %v7774_v48 = vld [vmem:[#allocation7 + $0x110] sm:$0xff]   ;;  %v7778_v52 = vld [vmem:[#allocation7 + $0x118] sm:$0xff]  }
  0xbf   : > { %6933 = vmatpush3.bf16.msra.mxu1 %v7743_v15  ;;  %6912 = vmatprep.subr.bf16.mxu0 %v7744_v16  ;;  %v7771_v45 = vld [vmem:[#allocation7 + $0x188] sm:$0xff]   ;;  %v7775_v49 = vld [vmem:[#allocation7 + $0x190] sm:$0xff]   ;;  %v7779_v53 = vld [vmem:[#allocation7 + $0x198] sm:$0xff]  }
  0xc0   : > { %6934 = vmatprep.subr.bf16.mxu1 %v7745_v17  ;;  %4782 = vmatprep.mubr.bf16.mxu1 %v6315_v37  ;;  %v7780_v54 = vld [vmem:[#allocation7 + $0x160] sm:$0xff]   ;;  %v7784_v58 = vld [vmem:[#allocation7 + $0x168] sm:$0xff]   ;;  %v7788_v62 = vld [vmem:[#allocation7 + $0x170] sm:$0xff]  }
  0xc1   : > { %v7781_v55 = vld [vmem:[#allocation7 + $0x1e0] sm:$0xff]   ;;  %v7785_v59 = vld [vmem:[#allocation7 + $0x1e8] sm:$0xff]   ;;  %v7789_v63 = vld [vmem:[#allocation7 + $0x1f0] sm:$0xff]  }
  0xc2   : > { %6913 = vmatpush3.bf16.msra.mxu0 %v7746_v18  ;;  %v7782_v56 = vld [vmem:[#allocation7 + $0x120] sm:$0xff]   ;;  %v7786_v60 = vld [vmem:[#allocation7 + $0x128] sm:$0xff]   ;;  %v7790_v0 = vld [vmem:[#allocation7 + $0x130] sm:$0xff]  }
  0xc3   : > { %6935 = vmatpush3.bf16.msra.mxu1 %v7747_v19  ;;  %6914 = vmatprep.subr.bf16.mxu0 %v7748_v20  ;;  %v7783_v57 = vld [vmem:[#allocation7 + $0x1a0] sm:$0xff]   ;;  %v7787_v61 = vld [vmem:[#allocation7 + $0x1a8] sm:$0xff]   ;;  %v7791_v1 = vld [vmem:[#allocation7 + $0x1b0] sm:$0xff]  }
  0xc4   : > { %6936 = vmatprep.subr.bf16.mxu1 %v7749_v21  ;;  %v7792_v2 = vld [vmem:[#allocation7 + $0x178] sm:$0xff]   ;;  %v360_v6 = vld [vmem:[%s8842_s20 + $0x10] sm:$0xff]  ;;  %v361_v9 = vld [vmem:[%s8842_s20 + $0x18] sm:$0xff] }
  0xc5   : > { %v7793_v3 = vld [vmem:[#allocation7 + $0x1f8] sm:$0xff]   ;;  %v6316_v7 = vcombine.low %v360_v6, %v360_v6  ;;  %v6317_v8 = vcombine.high %v360_v6, %v360_v6  ;;  %v6318_v10 = vcombine.low %v361_v9, %v361_v9  ;;  %v6319_v11 = vcombine.high %v361_v9, %v361_v9  ;;  %v7800_v12 = vld [vmem:[#allocation7 + $0x240] sm:$0xff]   ;;  %v7804_v16 = vld [vmem:[#allocation7 + $0x248] sm:$0xff]  }
  0xc6   : > { %6915 = vmatpush3.bf16.msra.mxu0 %v7750_v22  ;;  %v7794_v4 = vld [vmem:[#allocation7 + $0x138] sm:$0xff]   ;;  %v7801_v13 = vld [vmem:[#allocation7 + $0x2c0] sm:$0xff]   ;;  %v7805_v17 = vld [vmem:[#allocation7 + $0x2c8] sm:$0xff]  }
  0xc7   : > { %6937 = vmatpush3.bf16.msra.mxu1 %v7751_v23  ;;  %6916 = vmatprep.subr.bf16.mxu0 %v7752_v24  ;;  %v7795_v5 = vld [vmem:[#allocation7 + $0x1b8] sm:$0xff]   ;;  %v7802_v14 = vld [vmem:[#allocation7 + $0x200] sm:$0xff]   ;;  %v7806_v18 = vld [vmem:[#allocation7 + $0x208] sm:$0xff]  }
  0xc8   : > { %6938 = vmatprep.subr.bf16.mxu1 %v7753_v25  ;;  %v7803_v15 = vld [vmem:[#allocation7 + $0x280] sm:$0xff]   ;;  %v7807_v19 = vld [vmem:[#allocation7 + $0x288] sm:$0xff]   ;;  %v7808_v20 = vld [vmem:[#allocation7 + $0x250] sm:$0xff]  }
  0xc9   : > { %v7809_v21 = vld [vmem:[#allocation7 + $0x2d0] sm:$0xff]   ;;  %v7812_v24 = vld [vmem:[#allocation7 + $0x258] sm:$0xff]   ;;  %v7820_v32 = vld [vmem:[#allocation7 + $0x268] sm:$0xff]  }
  0xca   : > { %6917 = vmatpush3.bf16.msra.mxu0 %v7754_v26  ;;  %v7810_v22 = vld [vmem:[#allocation7 + $0x210] sm:$0xff]   ;;  %v7813_v25 = vld [vmem:[#allocation7 + $0x2d8] sm:$0xff]   ;;  %v7821_v33 = vld [vmem:[#allocation7 + $0x2e8] sm:$0xff]  }
  0xcb   : > { %6939 = vmatpush3.bf16.msra.mxu1 %v7755_v27  ;;  %6918 = vmatprep.subr.bf16.mxu0 %v7756_v28  ;;  %v7811_v23 = vld [vmem:[#allocation7 + $0x290] sm:$0xff]   ;;  %v7814_v26 = vld [vmem:[#allocation7 + $0x218] sm:$0xff]   ;;  %v7816_v28 = vld [vmem:[#allocation7 + $0x260] sm:$0xff]  }
  0xcc   : > { %6940 = vmatprep.subr.bf16.mxu1 %v7757_v29  ;;  %v7815_v27 = vld [vmem:[#allocation7 + $0x298] sm:$0xff]   ;;  %v7817_v29 = vld [vmem:[#allocation7 + $0x2e0] sm:$0xff]   ;;  %v7823_v35 = vld [vmem:[#allocation7 + $0x2a8] sm:$0xff]  }
  0xcd   : > { %v7825_v37 = vld [vmem:[#allocation7 + $0x2f0] sm:$0xff]   ;;  %v7856_v6 = vld [vmem:[#allocation7 + $0x368] sm:$0xff]  }
  0xce   : > { %6919 = vmatpush3.bf16.msra.mxu0 %v7758_v30  ;;  %v7818_v30 = vld [vmem:[#allocation7 + $0x220] sm:$0xff]   ;;  %v7859_v9 = vld [vmem:[#allocation7 + $0x3a8] sm:$0xff]  }
  0xcf   : > { %6941 = vmatpush3.bf16.msra.mxu1 %v7759_v31  ;;  %6948 = vmatprep.subr.bf16.mxu0 %v7764_v38  ;;  %v7819_v31 = vld [vmem:[#allocation7 + $0x2a0] sm:$0xff]   ;;  %v7826_v38 = vld [vmem:[#allocation7 + $0x230] sm:$0xff]  }
  0xd0   : > { %6970 = vmatprep.subr.bf16.mxu1 %v7765_v39  ;;  %v7827_v39 = vld [vmem:[#allocation7 + $0x2b0] sm:$0xff]  }
  0xd1   : > { %4743 = vmatmul.mubr.bf16.vlgmr.msra.gmra.mrb[0].mxu0 %v6312_v34  ;;  %v7822_v34 = vld [vmem:[#allocation7 + $0x228] sm:$0xff]  }
  0xd2   : > { %4783 = vmatmul.mubr.bf16.vlgmr.msra.gmra.mrb[0].mxu1 %v6314_v36  ;;  %6949 = vmatpush3.bf16.msra.mxu0 %v7766_v40  ;;  %v7824_v36 = vld [vmem:[#allocation7 + $0x270] sm:$0xff]   ;;  %v7828_v40 = vld [vmem:[#allocation7 + $0x278] sm:$0xff]  }
  0xd3   : > { %6971 = vmatpush3.bf16.msra.mxu1 %v7767_v41  ;;  %6950 = vmatprep.subr.bf16.mxu0 %v7768_v42  ;;  %v7829_v41 = vld [vmem:[#allocation7 + $0x2f8] sm:$0xff]  }
  0xd4   : > { %6972 = vmatprep.subr.bf16.mxu1 %v7769_v43  ;;  %4822 = vmatprep.mubr.bf16.mxu0 %v6317_v8  ;;  %v7830_v42 = vld [vmem:[#allocation7 + $0x238] sm:$0xff]   ;;  %v7858_v8 = vld [vmem:[#allocation7 + $0x328] sm:$0xff]  }
  0xd5   : > { %4862 = vmatprep.mubr.bf16.mxu1 %v6319_v11  ;;  %v7831_v43 = vld [vmem:[#allocation7 + $0x2b8] sm:$0xff]   ;;  %v7861_v11 = vld [vmem:[#allocation7 + $0x3f0] sm:$0xff]  }
  0xd6   : > { %6951 = vmatpush3.bf16.msra.mxu0 %v7770_v44  ;;  %v362_v44 = vld [vmem:[%s8842_s20 + $0x20] sm:$0xff] }
  0xd7   : > { %6973 = vmatpush3.bf16.msra.mxu1 %v7771_v45  ;;  %6952 = vmatprep.subr.bf16.mxu0 %v7772_v46  ;;  %v363_v45 = vld [vmem:[%s8842_s20 + $0x28] sm:$0xff]  ;;  %v6320_v46 = vcombine.low %v362_v44, %v362_v44 }
  0xd8   : > { %6974 = vmatprep.subr.bf16.mxu1 %v7773_v47  ;;  %v6321_v47 = vcombine.high %v362_v44, %v362_v44  ;;  %v7892_v44 = vld [vmem:[#allocation7 + $0x468] sm:$0xff]  }
  0xda   : > { %6953 = vmatpush3.bf16.msra.mxu0 %v7774_v48  ;;  %v6322_v48 = vcombine.low %v363_v45, %v363_v45 }
  0xdb   : > { %6975 = vmatpush3.bf16.msra.mxu1 %v7775_v49  ;;  %6954 = vmatprep.subr.bf16.mxu0 %v7776_v50  ;;  %v6323_v49 = vcombine.high %v363_v45, %v363_v45  ;;  %v7836_v50 = vld [vmem:[#allocation7 + $0x340] sm:$0xff]   ;;  %v7893_v45 = vld [vmem:[#allocation7 + $0x4e8] sm:$0xff]  }
  0xdc   : > { %6976 = vmatprep.subr.bf16.mxu1 %v7777_v51  ;;  %v7837_v51 = vld [vmem:[#allocation7 + $0x3c0] sm:$0xff]  }
  0xde   : > { %6955 = vmatpush3.bf16.msra.mxu0 %v7778_v52  ;;  %v7838_v52 = vld [vmem:[#allocation7 + $0x300] sm:$0xff]  }
  0xdf   : > { %6977 = vmatpush3.bf16.msra.mxu1 %v7779_v53  ;;  %6956 = vmatprep.subr.bf16.mxu0 %v7780_v54  ;;  %v7839_v53 = vld [vmem:[#allocation7 + $0x380] sm:$0xff]   ;;  %v7840_v54 = vld [vmem:[#allocation7 + $0x348] sm:$0xff]  }
  0xe0   : > { %6978 = vmatprep.subr.bf16.mxu1 %v7781_v55  ;;  %v7841_v55 = vld [vmem:[#allocation7 + $0x3c8] sm:$0xff]  }
  0xe2   : > { %6957 = vmatpush3.bf16.msra.mxu0 %v7782_v56  ;;  %v7842_v56 = vld [vmem:[#allocation7 + $0x308] sm:$0xff]  }
  0xe3   : > { %6979 = vmatpush3.bf16.msra.mxu1 %v7783_v57  ;;  %6958 = vmatprep.subr.bf16.mxu0 %v7784_v58  ;;  %v7843_v57 = vld [vmem:[#allocation7 + $0x388] sm:$0xff]   ;;  %v7844_v58 = vld [vmem:[#allocation7 + $0x350] sm:$0xff]  }
  0xe4   : > { %6980 = vmatprep.subr.bf16.mxu1 %v7785_v59  ;;  %v7845_v59 = vld [vmem:[#allocation7 + $0x3d0] sm:$0xff]  }
  0xe6   : > { %6959 = vmatpush3.bf16.msra.mxu0 %v7786_v60  ;;  %v7846_v60 = vld [vmem:[#allocation7 + $0x310] sm:$0xff]  }
  0xe7   : > { %6981 = vmatpush3.bf16.msra.mxu1 %v7787_v61  ;;  %6960 = vmatprep.subr.bf16.mxu0 %v7788_v62  ;;  %v7847_v61 = vld [vmem:[#allocation7 + $0x390] sm:$0xff]   ;;  %v7848_v62 = vld [vmem:[#allocation7 + $0x358] sm:$0xff]  }
  0xe8   : > { %6982 = vmatprep.subr.bf16.mxu1 %v7789_v63  ;;  %v7849_v63 = vld [vmem:[#allocation7 + $0x3d8] sm:$0xff]  }
  0xea   : > { %6961 = vmatpush3.bf16.msra.mxu0 %v7790_v0  ;;  %v7850_v0 = vld [vmem:[#allocation7 + $0x318] sm:$0xff]  }
  0xeb   : > { %6983 = vmatpush3.bf16.msra.mxu1 %v7791_v1  ;;  %6962 = vmatprep.subr.bf16.mxu0 %v7792_v2  ;;  %v7851_v1 = vld [vmem:[#allocation7 + $0x398] sm:$0xff]   ;;  %v7852_v2 = vld [vmem:[#allocation7 + $0x360] sm:$0xff]  }
  0xec   : > { %6984 = vmatprep.subr.bf16.mxu1 %v7793_v3  ;;  %v7853_v3 = vld [vmem:[#allocation7 + $0x3e0] sm:$0xff]  }
  0xee   : > { %6963 = vmatpush3.bf16.msra.mxu0 %v7794_v4  ;;  %v7854_v4 = vld [vmem:[#allocation7 + $0x320] sm:$0xff]  }
  0xef   : > { %6985 = vmatpush3.bf16.msra.mxu1 %v7795_v5  ;;  %6992 = vmatprep.subr.bf16.mxu0 %v7800_v12  ;;  %v7855_v5 = vld [vmem:[#allocation7 + $0x3a0] sm:$0xff]   ;;  %v7862_v12 = vld [vmem:[#allocation7 + $0x330] sm:$0xff]  }
  0xf0   : > { %7014 = vmatprep.subr.bf16.mxu1 %v7801_v13  ;;  %v7863_v13 = vld [vmem:[#allocation7 + $0x3b0] sm:$0xff]  }
  0xf1   : > { %4823 = vmatmul.mubr.bf16.vlgmr.msra.gmra.mrb[4].mxu0 %v6316_v7  ;;  %v7857_v7 = vld [vmem:[#allocation7 + $0x3e8] sm:$0xff]  }
  0xf2   : > { %4863 = vmatmul.mubr.bf16.vlgmr.msra.gmra.mrb[4].mxu1 %v6318_v10  ;;  %6993 = vmatpush3.bf16.msra.mxu0 %v7802_v14  ;;  %v7860_v10 = vld [vmem:[#allocation7 + $0x370] sm:$0xff]   ;;  %v7864_v14 = vld [vmem:[#allocation7 + $0x378] sm:$0xff]  }
  0xf3   : > { %7015 = vmatpush3.bf16.msra.mxu1 %v7803_v15  ;;  %6994 = vmatprep.subr.bf16.mxu0 %v7804_v16  ;;  %v7865_v15 = vld [vmem:[#allocation7 + $0x3f8] sm:$0xff]  }
  0xf4   : > { %7016 = vmatprep.subr.bf16.mxu1 %v7805_v17  ;;  %4902 = vmatprep.mubr.bf16.mxu0 %v6321_v47  ;;  %v7866_v16 = vld [vmem:[#allocation7 + $0x338] sm:$0xff]   ;;  %v7895_v47 = vld [vmem:[#allocation7 + $0x4a8] sm:$0xff]  }
  0xf5   : > { %4942 = vmatprep.mubr.bf16.mxu1 %v6323_v49  ;;  %v7867_v17 = vld [vmem:[#allocation7 + $0x3b8] sm:$0xff]   ;;  %v7897_v49 = vld [vmem:[#allocation7 + $0x4f0] sm:$0xff]  }
  0xf6   : > { %6995 = vmatpush3.bf16.msra.mxu0 %v7806_v18  ;;  %v364_v18 = vld [vmem:[%s8842_s20 + $0x30] sm:$0xff] }
  0xf7   : > { %7017 = vmatpush3.bf16.msra.mxu1 %v7807_v19  ;;  %6996 = vmatprep.subr.bf16.mxu0 %v7808_v20  ;;  %v365_v19 = vld [vmem:[%s8842_s20 + $0x38] sm:$0xff]  ;;  %v6324_v20 = vcombine.low %v364_v18, %v364_v18 }
  0xf8   : > { %7018 = vmatprep.subr.bf16.mxu1 %v7809_v21  ;;  %v6325_v21 = vcombine.high %v364_v18, %v364_v18  ;;  %v7928_v18 = vld [vmem:[#allocation7 + $0x568] sm:$0xff]  }
  0xfa   : > { %6997 = vmatpush3.bf16.msra.mxu0 %v7810_v22  ;;  %v6326_v22 = vcombine.low %v365_v19, %v365_v19 }
  0xfb   : > { %7019 = vmatpush3.bf16.msra.mxu1 %v7811_v23  ;;  %6998 = vmatprep.subr.bf16.mxu0 %v7812_v24  ;;  %v7872_v23 = vld [vmem:[#allocation7 + $0x440] sm:$0xff]   ;;  %v6327_v24 = vcombine.high %v365_v19, %v365_v19  ;;  %v7929_v19 = vld [vmem:[#allocation7 + $0x5e8] sm:$0xff]  }
  0xfc   : > { %7020 = vmatprep.subr.bf16.mxu1 %v7813_v25  ;;  %v7873_v25 = vld [vmem:[#allocation7 + $0x4c0] sm:$0xff]  }
  0xfe   : > { %6999 = vmatpush3.bf16.msra.mxu0 %v7814_v26  ;;  %v7874_v26 = vld [vmem:[#allocation7 + $0x400] sm:$0xff]  }
  0xff   : > { %7021 = vmatpush3.bf16.msra.mxu1 %v7815_v27  ;;  %7000 = vmatprep.subr.bf16.mxu0 %v7816_v28  ;;  %v7875_v27 = vld [vmem:[#allocation7 + $0x480] sm:$0xff]   ;;  %v7876_v28 = vld [vmem:[#allocation7 + $0x448] sm:$0xff]  }
 0x100   : > { %7022 = vmatprep.subr.bf16.mxu1 %v7817_v29  ;;  %v7877_v29 = vld [vmem:[#allocation7 + $0x4c8] sm:$0xff]  }
 0x102   : > { %7001 = vmatpush3.bf16.msra.mxu0 %v7818_v30  ;;  %v7878_v30 = vld [vmem:[#allocation7 + $0x408] sm:$0xff]  }
 0x103   : > { %7023 = vmatpush3.bf16.msra.mxu1 %v7819_v31  ;;  %7002 = vmatprep.subr.bf16.mxu0 %v7820_v32  ;;  %v7879_v31 = vld [vmem:[#allocation7 + $0x488] sm:$0xff]   ;;  %v7880_v32 = vld [vmem:[#allocation7 + $0x450] sm:$0xff]  }
 0x104   : > { %7024 = vmatprep.subr.bf16.mxu1 %v7821_v33  ;;  %v7881_v33 = vld [vmem:[#allocation7 + $0x4d0] sm:$0xff]  }
 0x106   : > { %7003 = vmatpush3.bf16.msra.mxu0 %v7822_v34  ;;  %v7882_v34 = vld [vmem:[#allocation7 + $0x410] sm:$0xff]  }
 0x107   : > { %7025 = vmatpush3.bf16.msra.mxu1 %v7823_v35  ;;  %7004 = vmatprep.subr.bf16.mxu0 %v7824_v36  ;;  %v7883_v35 = vld [vmem:[#allocation7 + $0x490] sm:$0xff]   ;;  %v7884_v36 = vld [vmem:[#allocation7 + $0x458] sm:$0xff]  }
 0x108   : > { %7026 = vmatprep.subr.bf16.mxu1 %v7825_v37  ;;  %v7885_v37 = vld [vmem:[#allocation7 + $0x4d8] sm:$0xff]  }
 0x10a   : > { %7005 = vmatpush3.bf16.msra.mxu0 %v7826_v38  ;;  %v7886_v38 = vld [vmem:[#allocation7 + $0x418] sm:$0xff]  }
 0x10b   : > { %7027 = vmatpush3.bf16.msra.mxu1 %v7827_v39  ;;  %7006 = vmatprep.subr.bf16.mxu0 %v7828_v40  ;;  %v7887_v39 = vld [vmem:[#allocation7 + $0x498] sm:$0xff]   ;;  %v7888_v40 = vld [vmem:[#allocation7 + $0x460] sm:$0xff]  }
 0x10c   : > { %7028 = vmatprep.subr.bf16.mxu1 %v7829_v41  ;;  %v7889_v41 = vld [vmem:[#allocation7 + $0x4e0] sm:$0xff]  }
 0x10e   : > { %7007 = vmatpush3.bf16.msra.mxu0 %v7830_v42  ;;  %v7890_v42 = vld [vmem:[#allocation7 + $0x420] sm:$0xff]  }
 0x10f   : > { %7029 = vmatpush3.bf16.msra.mxu1 %v7831_v43  ;;  %7036 = vmatprep.subr.bf16.mxu0 %v7836_v50  ;;  %v7891_v43 = vld [vmem:[#allocation7 + $0x4a0] sm:$0xff]   ;;  %v7898_v50 = vld [vmem:[#allocation7 + $0x430] sm:$0xff]  }
 0x110   : > { %7058 = vmatprep.subr.bf16.mxu1 %v7837_v51  ;;  %v7899_v51 = vld [vmem:[#allocation7 + $0x4b0] sm:$0xff]  }
 0x111   : > { %4903 = vmatmul.mubr.bf16.vlgmr.msra.gmra.mrb[8].mxu0 %v6320_v46  ;;  %v7894_v46 = vld [vmem:[#allocation7 + $0x428] sm:$0xff]  }
 0x112   : > { %4943 = vmatmul.mubr.bf16.vlgmr.msra.gmra.mrb[8].mxu1 %v6322_v48  ;;  %7037 = vmatpush3.bf16.msra.mxu0 %v7838_v52  ;;  %v7896_v48 = vld [vmem:[#allocation7 + $0x470] sm:$0xff]   ;;  %v7900_v52 = vld [vmem:[#allocation7 + $0x478] sm:$0xff]  }
 0x113   : > { %7059 = vmatpush3.bf16.msra.mxu1 %v7839_v53  ;;  %7038 = vmatprep.subr.bf16.mxu0 %v7840_v54  ;;  %v7901_v53 = vld [vmem:[#allocation7 + $0x4f8] sm:$0xff]  }
 0x114   : > { %7060 = vmatprep.subr.bf16.mxu1 %v7841_v55  ;;  %4982 = vmatprep.mubr.bf16.mxu0 %v6325_v21  ;;  %v7902_v54 = vld [vmem:[#allocation7 + $0x438] sm:$0xff]   ;;  %v7931_v21 = vld [vmem:[#allocation7 + $0x5a8] sm:$0xff]  }
 0x115   : > { %5022 = vmatprep.mubr.bf16.mxu1 %v6327_v24  ;;  %v7903_v55 = vld [vmem:[#allocation7 + $0x4b8] sm:$0xff]   ;;  %v7934_v24 = vld [vmem:[#allocation7 + $0x530] sm:$0xff]  }
 0x116   : > { %7039 = vmatpush3.bf16.msra.mxu0 %v7842_v56  ;;  %v366_v56 = vld [vmem:[%s8842_s20 + $0x40] sm:$0xff] }
 0x117   : > { %7061 = vmatpush3.bf16.msra.mxu1 %v7843_v57  ;;  %7040 = vmatprep.subr.bf16.mxu0 %v7844_v58  ;;  %v6328_v57 = vcombine.low %v366_v56, %v366_v56  ;;  %v6329_v58 = vcombine.high %v366_v56, %v366_v56  ;;  %v7964_v56 = vld [vmem:[#allocation7 + $0x668] sm:$0xff]  }
 0x118   : > { %7062 = vmatprep.subr.bf16.mxu1 %v7845_v59  ;;  %v367_v59 = vld [vmem:[%s8842_s20 + $0x48] sm:$0xff] }
 0x11a   : > { %7041 = vmatpush3.bf16.msra.mxu0 %v7846_v60  ;;  %v6330_v60 = vcombine.low %v367_v59, %v367_v59 }
 0x11b   : > { %7063 = vmatpush3.bf16.msra.mxu1 %v7847_v61  ;;  %7042 = vmatprep.subr.bf16.mxu0 %v7848_v62  ;;  %v6331_v61 = vcombine.high %v367_v59, %v367_v59  ;;  %v7908_v62 = vld [vmem:[#allocation7 + $0x540] sm:$0xff]   ;;  %v7967_v59 = vld [vmem:[#allocation7 + $0x6a8] sm:$0xff]  }
 0x11c   : > { %7064 = vmatprep.subr.bf16.mxu1 %v7849_v63  ;;  %v7909_v63 = vld [vmem:[#allocation7 + $0x5c0] sm:$0xff]  }
 0x11e   : > { %7043 = vmatpush3.bf16.msra.mxu0 %v7850_v0  ;;  %v7910_v0 = vld [vmem:[#allocation7 + $0x500] sm:$0xff]  }
 0x11f   : > { %7065 = vmatpush3.bf16.msra.mxu1 %v7851_v1  ;;  %7044 = vmatprep.subr.bf16.mxu0 %v7852_v2  ;;  %v7911_v1 = vld [vmem:[#allocation7 + $0x580] sm:$0xff]   ;;  %v7912_v2 = vld [vmem:[#allocation7 + $0x548] sm:$0xff]  }
 0x120   : > { %7066 = vmatprep.subr.bf16.mxu1 %v7853_v3  ;;  %v7913_v3 = vld [vmem:[#allocation7 + $0x5c8] sm:$0xff]  }
 0x122   : > { %7045 = vmatpush3.bf16.msra.mxu0 %v7854_v4  ;;  %v7914_v4 = vld [vmem:[#allocation7 + $0x508] sm:$0xff]  }
 0x123   : > { %7067 = vmatpush3.bf16.msra.mxu1 %v7855_v5  ;;  %7046 = vmatprep.subr.bf16.mxu0 %v7856_v6  ;;  %v7915_v5 = vld [vmem:[#allocation7 + $0x588] sm:$0xff]   ;;  %v7916_v6 = vld [vmem:[#allocation7 + $0x550] sm:$0xff]  }
 0x124   : > { %7068 = vmatprep.subr.bf16.mxu1 %v7857_v7  ;;  %v7917_v7 = vld [vmem:[#allocation7 + $0x5d0] sm:$0xff]  }
 0x126   : > { %7047 = vmatpush3.bf16.msra.mxu0 %v7858_v8  ;;  %v7918_v8 = vld [vmem:[#allocation7 + $0x510] sm:$0xff]  }
 0x127   : > { %7069 = vmatpush3.bf16.msra.mxu1 %v7859_v9  ;;  %7048 = vmatprep.subr.bf16.mxu0 %v7860_v10  ;;  %v7919_v9 = vld [vmem:[#allocation7 + $0x590] sm:$0xff]   ;;  %v7920_v10 = vld [vmem:[#allocation7 + $0x558] sm:$0xff]  }
 0x128   : > { %7070 = vmatprep.subr.bf16.mxu1 %v7861_v11  ;;  %v7921_v11 = vld [vmem:[#allocation7 + $0x5d8] sm:$0xff]  }
 0x12a   : > { %7049 = vmatpush3.bf16.msra.mxu0 %v7862_v12  ;;  %v7922_v12 = vld [vmem:[#allocation7 + $0x518] sm:$0xff]  }
 0x12b   : > { %7071 = vmatpush3.bf16.msra.mxu1 %v7863_v13  ;;  %7050 = vmatprep.subr.bf16.mxu0 %v7864_v14  ;;  %v7923_v13 = vld [vmem:[#allocation7 + $0x598] sm:$0xff]   ;;  %v7924_v14 = vld [vmem:[#allocation7 + $0x560] sm:$0xff]  }
 0x12c   : > { %7072 = vmatprep.subr.bf16.mxu1 %v7865_v15  ;;  %v7925_v15 = vld [vmem:[#allocation7 + $0x5e0] sm:$0xff]  }
 0x12e   : > { %7051 = vmatpush3.bf16.msra.mxu0 %v7866_v16  ;;  %v7926_v16 = vld [vmem:[#allocation7 + $0x520] sm:$0xff]  }
 0x12f   : > { %7073 = vmatpush3.bf16.msra.mxu1 %v7867_v17  ;;  %7080 = vmatprep.subr.bf16.mxu0 %v7872_v23  ;;  %v7927_v17 = vld [vmem:[#allocation7 + $0x5a0] sm:$0xff]   ;;  %v7933_v23 = vld [vmem:[#allocation7 + $0x5f0] sm:$0xff]  }
 0x130   : > { %7102 = vmatprep.subr.bf16.mxu1 %v7873_v25  ;;  %v7935_v25 = vld [vmem:[#allocation7 + $0x5b0] sm:$0xff]  }
 0x131   : > { %4983 = vmatmul.mubr.bf16.vlgmr.msra.gmra.mrb[12].mxu0 %v6324_v20  ;;  %v7930_v20 = vld [vmem:[#allocation7 + $0x528] sm:$0xff]  }
 0x132   : > { %5023 = vmatmul.mubr.bf16.vlgmr.msra.gmra.mrb[12].mxu1 %v6326_v22  ;;  %7081 = vmatpush3.bf16.msra.mxu0 %v7874_v26  ;;  %v7932_v22 = vld [vmem:[#allocation7 + $0x570] sm:$0xff]   ;;  %v7936_v26 = vld [vmem:[#allocation7 + $0x578] sm:$0xff]  }
 0x133   : > { %7103 = vmatpush3.bf16.msra.mxu1 %v7875_v27  ;;  %7082 = vmatprep.subr.bf16.mxu0 %v7876_v28  ;;  %v7937_v27 = vld [vmem:[#allocation7 + $0x5f8] sm:$0xff]  }
 0x134   : > { %7104 = vmatprep.subr.bf16.mxu1 %v7877_v29  ;;  %5062 = vmatprep.mubr.bf16.mxu0 %v6329_v58  ;;  %v7938_v28 = vld [vmem:[#allocation7 + $0x538] sm:$0xff]   ;;  %v7966_v58 = vld [vmem:[#allocation7 + $0x628] sm:$0xff]  }
 0x135   : > { %5102 = vmatprep.mubr.bf16.mxu1 %v6331_v61  ;;  %v7939_v29 = vld [vmem:[#allocation7 + $0x5b8] sm:$0xff]   ;;  %v7969_v61 = vld [vmem:[#allocation7 + $0x6f0] sm:$0xff]  }
 0x136   : > { %7083 = vmatpush3.bf16.msra.mxu0 %v7878_v30  ;;  %v368_v30 = vld [vmem:[%s8842_s20 + $0x50] sm:$0xff] }
 0x137   : > { %7105 = vmatpush3.bf16.msra.mxu1 %v7879_v31  ;;  %7084 = vmatprep.subr.bf16.mxu0 %v7880_v32  ;;  %v369_v31 = vld [vmem:[%s8842_s20 + $0x58] sm:$0xff]  ;;  %v6332_v32 = vcombine.low %v368_v30, %v368_v30 }
 0x138   : > { %7106 = vmatprep.subr.bf16.mxu1 %v7881_v33  ;;  %v6333_v33 = vcombine.high %v368_v30, %v368_v30  ;;  %v7999_v30 = vld [vmem:[#allocation7 + $0x7a0] sm:$0xff]  }
 0x13a   : > { %7085 = vmatpush3.bf16.msra.mxu0 %v7882_v34  ;;  %v6334_v34 = vcombine.low %v369_v31, %v369_v31 }
 0x13b   : > { %7107 = vmatpush3.bf16.msra.mxu1 %v7883_v35  ;;  %7086 = vmatprep.subr.bf16.mxu0 %v7884_v36  ;;  %v6335_v35 = vcombine.high %v369_v31, %v369_v31  ;;  %v7944_v36 = vld [vmem:[#allocation7 + $0x640] sm:$0xff]  }
 0x13c   : > { %7108 = vmatprep.subr.bf16.mxu1 %v7885_v37  ;;  %v7945_v37 = vld [vmem:[#allocation7 + $0x6c0] sm:$0xff]  }
 0x13e   : > { %7087 = vmatpush3.bf16.msra.mxu0 %v7886_v38  ;;  %v7946_v38 = vld [vmem:[#allocation7 + $0x600] sm:$0xff]  }
 0x13f   : > { %7109 = vmatpush3.bf16.msra.mxu1 %v7887_v39  ;;  %7088 = vmatprep.subr.bf16.mxu0 %v7888_v40  ;;  %v7947_v39 = vld [vmem:[#allocation7 + $0x680] sm:$0xff]   ;;  %v7948_v40 = vld [vmem:[#allocation7 + $0x648] sm:$0xff]  }
 0x140   : > { %7110 = vmatprep.subr.bf16.mxu1 %v7889_v41  ;;  %v7949_v41 = vld [vmem:[#allocation7 + $0x6c8] sm:$0xff]  }
 0x142   : > { %7089 = vmatpush3.bf16.msra.mxu0 %v7890_v42  ;;  %v7950_v42 = vld [vmem:[#allocation7 + $0x608] sm:$0xff]  }
 0x143   : > { %7111 = vmatpush3.bf16.msra.mxu1 %v7891_v43  ;;  %7090 = vmatprep.subr.bf16.mxu0 %v7892_v44  ;;  %v7951_v43 = vld [vmem:[#allocation7 + $0x688] sm:$0xff]   ;;  %v7952_v44 = vld [vmem:[#allocation7 + $0x650] sm:$0xff]  }
 0x144   : > { %7112 = vmatprep.subr.bf16.mxu1 %v7893_v45  ;;  %v7953_v45 = vld [vmem:[#allocation7 + $0x6d0] sm:$0xff]  }
 0x146   : > { %7091 = vmatpush3.bf16.msra.mxu0 %v7894_v46  ;;  %v7954_v46 = vld [vmem:[#allocation7 + $0x610] sm:$0xff]  }
 0x147   : > { %7113 = vmatpush3.bf16.msra.mxu1 %v7895_v47  ;;  %7092 = vmatprep.subr.bf16.mxu0 %v7896_v48  ;;  %v7955_v47 = vld [vmem:[#allocation7 + $0x690] sm:$0xff]   ;;  %v7956_v48 = vld [vmem:[#allocation7 + $0x658] sm:$0xff]  }
 0x148   : > { %7114 = vmatprep.subr.bf16.mxu1 %v7897_v49  ;;  %v7957_v49 = vld [vmem:[#allocation7 + $0x6d8] sm:$0xff]  }
 0x14a   : > { %7093 = vmatpush3.bf16.msra.mxu0 %v7898_v50  ;;  %v7958_v50 = vld [vmem:[#allocation7 + $0x618] sm:$0xff]  }
 0x14b   : > { %7115 = vmatpush3.bf16.msra.mxu1 %v7899_v51  ;;  %7094 = vmatprep.subr.bf16.mxu0 %v7900_v52  ;;  %v7959_v51 = vld [vmem:[#allocation7 + $0x698] sm:$0xff]   ;;  %v7960_v52 = vld [vmem:[#allocation7 + $0x660] sm:$0xff]  }
 0x14c   : > { %7116 = vmatprep.subr.bf16.mxu1 %v7901_v53  ;;  %v7961_v53 = vld [vmem:[#allocation7 + $0x6e0] sm:$0xff]  }
 0x14e   : > { %7095 = vmatpush3.bf16.msra.mxu0 %v7902_v54  ;;  %v7962_v54 = vld [vmem:[#allocation7 + $0x620] sm:$0xff]  }
 0x14f   : > { %7117 = vmatpush3.bf16.msra.mxu1 %v7903_v55  ;;  %7124 = vmatprep.subr.bf16.mxu0 %v7908_v62  ;;  %v7963_v55 = vld [vmem:[#allocation7 + $0x6a0] sm:$0xff]   ;;  %v7970_v62 = vld [vmem:[#allocation7 + $0x630] sm:$0xff]  }
 0x150   : > { %7146 = vmatprep.subr.bf16.mxu1 %v7909_v63  ;;  %v7971_v63 = vld [vmem:[#allocation7 + $0x6b0] sm:$0xff]  }
 0x151   : > { %5063 = vmatmul.mubr.bf16.vlgmr.msra.gmra.mrb[16].mxu0 %v6328_v57  ;;  %v7965_v57 = vld [vmem:[#allocation7 + $0x6e8] sm:$0xff]  }
 0x152   : > { %5103 = vmatmul.mubr.bf16.vlgmr.msra.gmra.mrb[16].mxu1 %v6330_v60  ;;  %7125 = vmatpush3.bf16.msra.mxu0 %v7910_v0  ;;  %v7968_v60 = vld [vmem:[#allocation7 + $0x670] sm:$0xff]   ;;  %v7972_v0 = vld [vmem:[#allocation7 + $0x678] sm:$0xff]  }
 0x153   : > { %7147 = vmatpush3.bf16.msra.mxu1 %v7911_v1  ;;  %7126 = vmatprep.subr.bf16.mxu0 %v7912_v2  ;;  %v7973_v1 = vld [vmem:[#allocation7 + $0x6f8] sm:$0xff]  }
 0x154   : > { %7148 = vmatprep.subr.bf16.mxu1 %v7913_v3  ;;  %5142 = vmatprep.mubr.bf16.mxu0 %v6333_v33  ;;  %v7974_v2 = vld [vmem:[#allocation7 + $0x638] sm:$0xff]   ;;  %v8000_v33 = vld [vmem:[#allocation7 + $0x768] sm:$0xff]  }
 0x155   : > { %5182 = vmatprep.mubr.bf16.mxu1 %v6335_v35  ;;  %v7975_v3 = vld [vmem:[#allocation7 + $0x6b8] sm:$0xff]  }
 0x156   : > { %7127 = vmatpush3.bf16.msra.mxu0 %v7914_v4  ;;  %v370_v4 = vld [vmem:[%s8842_s20 + $0x60] sm:$0xff] }
 0x157   : > { %7149 = vmatpush3.bf16.msra.mxu1 %v7915_v5  ;;  %7128 = vmatprep.subr.bf16.mxu0 %v7916_v6  ;;  %v371_v5 = vld [vmem:[%s8842_s20 + $0x68] sm:$0xff]  ;;  %v6336_v6 = vcombine.low %v370_v4, %v370_v4 }
 0x158   : > { %7150 = vmatprep.subr.bf16.mxu1 %v7917_v7  ;;  %v6337_v7 = vcombine.high %v370_v4, %v370_v4  ;;  %v8025_v4 = vld [vmem:[#allocation7 + $0x8d0] sm:$0xff]  }
 0x15a   : > { %7129 = vmatpush3.bf16.msra.mxu0 %v7918_v8  ;;  %v6338_v8 = vcombine.low %v371_v5, %v371_v5 }
 0x15b   : > { %7151 = vmatpush3.bf16.msra.mxu1 %v7919_v9  ;;  %7130 = vmatprep.subr.bf16.mxu0 %v7920_v10  ;;  %v7980_v9 = vld [vmem:[#allocation7 + $0x740] sm:$0xff]   ;;  %v6339_v10 = vcombine.high %v371_v5, %v371_v5  ;;  %v8026_v5 = vld [vmem:[#allocation7 + $0x810] sm:$0xff]  }
 0x15c   : > { %7152 = vmatprep.subr.bf16.mxu1 %v7921_v11  ;;  %v7981_v11 = vld [vmem:[#allocation7 + $0x7c0] sm:$0xff]  }
 0x15e   : > { %7131 = vmatpush3.bf16.msra.mxu0 %v7922_v12  ;;  %v7982_v12 = vld [vmem:[#allocation7 + $0x700] sm:$0xff]  }
 0x15f   : > { %7153 = vmatpush3.bf16.msra.mxu1 %v7923_v13  ;;  %7132 = vmatprep.subr.bf16.mxu0 %v7924_v14  ;;  %v7983_v13 = vld [vmem:[#allocation7 + $0x780] sm:$0xff]   ;;  %v7984_v14 = vld [vmem:[#allocation7 + $0x748] sm:$0xff]  }
 0x160   : > { %7154 = vmatprep.subr.bf16.mxu1 %v7925_v15  ;;  %v7985_v15 = vld [vmem:[#allocation7 + $0x7c8] sm:$0xff]  }
 0x162   : > { %7133 = vmatpush3.bf16.msra.mxu0 %v7926_v16  ;;  %v7986_v16 = vld [vmem:[#allocation7 + $0x708] sm:$0xff]  }
 0x163   : > { %7155 = vmatpush3.bf16.msra.mxu1 %v7927_v17  ;;  %7134 = vmatprep.subr.bf16.mxu0 %v7928_v18  ;;  %v7987_v17 = vld [vmem:[#allocation7 + $0x788] sm:$0xff]   ;;  %v7988_v18 = vld [vmem:[#allocation7 + $0x750] sm:$0xff]  }
 0x164   : > { %7156 = vmatprep.subr.bf16.mxu1 %v7929_v19  ;;  %v7989_v19 = vld [vmem:[#allocation7 + $0x7d0] sm:$0xff]  }
 0x166   : > { %7135 = vmatpush3.bf16.msra.mxu0 %v7930_v20  ;;  %v7990_v20 = vld [vmem:[#allocation7 + $0x710] sm:$0xff]  }
 0x167   : > { %7157 = vmatpush3.bf16.msra.mxu1 %v7931_v21  ;;  %7136 = vmatprep.subr.bf16.mxu0 %v7932_v22  ;;  %v7991_v21 = vld [vmem:[#allocation7 + $0x790] sm:$0xff]   ;;  %v7992_v22 = vld [vmem:[#allocation7 + $0x758] sm:$0xff]  }
 0x168   : > { %7158 = vmatprep.subr.bf16.mxu1 %v7933_v23  ;;  %v7993_v23 = vld [vmem:[#allocation7 + $0x7d8] sm:$0xff]  }
 0x16a   : > { %7137 = vmatpush3.bf16.msra.mxu0 %v7934_v24  ;;  %v7994_v24 = vld [vmem:[#allocation7 + $0x718] sm:$0xff]  }
 0x16b   : > { %7159 = vmatpush3.bf16.msra.mxu1 %v7935_v25  ;;  %7138 = vmatprep.subr.bf16.mxu0 %v7936_v26  ;;  %v7995_v25 = vld [vmem:[#allocation7 + $0x798] sm:$0xff]   ;;  %v7996_v26 = vld [vmem:[#allocation7 + $0x760] sm:$0xff]  }
 0x16c   : > { %7160 = vmatprep.subr.bf16.mxu1 %v7937_v27  ;;  %v7997_v27 = vld [vmem:[#allocation7 + $0x7e0] sm:$0xff]  }
 0x16e   : > { %7139 = vmatpush3.bf16.msra.mxu0 %v7938_v28  ;;  %v7998_v28 = vld [vmem:[#allocation7 + $0x720] sm:$0xff]  }
 0x16f   : > { %7161 = vmatpush3.bf16.msra.mxu1 %v7939_v29  ;;  %7168 = vmatprep.subr.bf16.mxu0 %v7944_v36  ;;  %v8001_v36 = vld [vmem:[#allocation7 + $0x7e8] sm:$0xff]  }
 0x170   : > { %7190 = vmatprep.subr.bf16.mxu1 %v7945_v37 }
 0x171   : > { %5143 = vmatmul.mubr.bf16.vlgmr.msra.gmra.mrb[20].mxu0 %v6332_v32 }
 0x172   : > { %5183 = vmatmul.mubr.bf16.vlgmr.msra.gmra.mrb[20].mxu1 %v6334_v34  ;;  %7169 = vmatpush3.bf16.msra.mxu0 %v7946_v38 }
 0x173   : > { %7191 = vmatpush3.bf16.msra.mxu1 %v7947_v39  ;;  %7170 = vmatprep.subr.bf16.mxu0 %v7948_v40  ;;  %v8002_v40 = vld [vmem:[#allocation7 + $0x728] sm:$0xff]  }
 0x174   : > { %7192 = vmatprep.subr.bf16.mxu1 %v7949_v41  ;;  %5222 = vmatprep.mubr.bf16.mxu0 %v6337_v7  ;;  %v8028_v7 = vld [vmem:[#allocation7 + $0x858] sm:$0xff]  }
 0x175   : > { %5262 = vmatprep.mubr.bf16.mxu1 %v6339_v10  ;;  %v8031_v10 = vld [vmem:[#allocation7 + $0x898] sm:$0xff]  }
 0x176   : > { %7171 = vmatpush3.bf16.msra.mxu0 %v7950_v42 }
 0x177   : > { %7193 = vmatpush3.bf16.msra.mxu1 %v7951_v43  ;;  %7172 = vmatprep.subr.bf16.mxu0 %v7952_v44  ;;  %v8003_v43 = vld [vmem:[#allocation7 + $0x7a8] sm:$0xff]  }
 0x178   : > { %7194 = vmatprep.subr.bf16.mxu1 %v7953_v45  ;;  %v8004_v45 = vld [vmem:[#allocation7 + $0x770] sm:$0xff]  }
 0x17a   : > { %7173 = vmatpush3.bf16.msra.mxu0 %v7954_v46  ;;  %v8005_v46 = vld [vmem:[#allocation7 + $0x7f0] sm:$0xff]  }
 0x17b   : > { %7195 = vmatpush3.bf16.msra.mxu1 %v7955_v47  ;;  %7174 = vmatprep.subr.bf16.mxu0 %v7956_v48  ;;  %v8006_v47 = vld [vmem:[#allocation7 + $0x730] sm:$0xff]  }
 0x17c   : > { %7196 = vmatprep.subr.bf16.mxu1 %v7957_v49  ;;  %v8007_v48 = vld [vmem:[#allocation7 + $0x7b0] sm:$0xff]   ;;  %v8008_v49 = vld [vmem:[#allocation7 + $0x778] sm:$0xff]  }
 0x17e   : > { %7175 = vmatpush3.bf16.msra.mxu0 %v7958_v50  ;;  %v8009_v50 = vld [vmem:[#allocation7 + $0x7f8] sm:$0xff]  }
 0x17f   : > { %7197 = vmatpush3.bf16.msra.mxu1 %v7959_v51  ;;  %7176 = vmatprep.subr.bf16.mxu0 %v7960_v52  ;;  %v8010_v51 = vld [vmem:[#allocation7 + $0x738] sm:$0xff]  }
 0x180   : > { %7198 = vmatprep.subr.bf16.mxu1 %v7961_v53  ;;  %v8011_v52 = vld [vmem:[#allocation7 + $0x7b8] sm:$0xff]   ;;  %v372_v53 = vld [vmem:[%s8842_s20 + $0x70] sm:$0xff] }
 0x182   : > { %7177 = vmatpush3.bf16.msra.mxu0 %v7962_v54  ;;  %v373_v54 = vld [vmem:[%s8842_s20 + $0x78] sm:$0xff] }
 0x183   : > { %7199 = vmatpush3.bf16.msra.mxu1 %v7963_v55  ;;  %7178 = vmatprep.subr.bf16.mxu0 %v7964_v56  ;;  %v6340_v55 = vcombine.low %v372_v53, %v372_v53  ;;  %v6341_v56 = vcombine.high %v372_v53, %v372_v53  ;;  %v8060_v53 = vld [vmem:[#allocation7 + $0x950] sm:$0xff]  }
 0x184   : > { %7200 = vmatprep.subr.bf16.mxu1 %v7965_v57  ;;  %v6342_v57 = vcombine.low %v373_v54, %v373_v54 }
 0x186   : > { %7179 = vmatpush3.bf16.msra.mxu0 %v7966_v58  ;;  %v8016_v58 = vld [vmem:[#allocation7 + $0x840] sm:$0xff]  }
 0x187   : > { %7201 = vmatpush3.bf16.msra.mxu1 %v7967_v59  ;;  %7180 = vmatprep.subr.bf16.mxu0 %v7968_v60  ;;  %v6343_v59 = vcombine.high %v373_v54, %v373_v54  ;;  %v8017_v60 = vld [vmem:[#allocation7 + $0x8c0] sm:$0xff]   ;;  %v8061_v54 = vld [vmem:[#allocation7 + $0x9d0] sm:$0xff]  }
 0x188   : > { %7202 = vmatprep.subr.bf16.mxu1 %v7969_v61  ;;  %v8018_v61 = vld [vmem:[#allocation7 + $0x800] sm:$0xff]  }
 0x18a   : > { %7181 = vmatpush3.bf16.msra.mxu0 %v7970_v62  ;;  %v8019_v62 = vld [vmem:[#allocation7 + $0x880] sm:$0xff]  }
 0x18b   : > { %7203 = vmatpush3.bf16.msra.mxu1 %v7971_v63  ;;  %7182 = vmatprep.subr.bf16.mxu0 %v7972_v0  ;;  %v8020_v63 = vld [vmem:[#allocation7 + $0x848] sm:$0xff]  }
 0x18c   : > { %7204 = vmatprep.subr.bf16.mxu1 %v7973_v1  ;;  %v8021_v0 = vld [vmem:[#allocation7 + $0x8c8] sm:$0xff]  }
 0x18d   : > { %v8022_v1 = vld [vmem:[#allocation7 + $0x808] sm:$0xff]  }
 0x18e   : > { %7183 = vmatpush3.bf16.msra.mxu0 %v7974_v2  ;;  %v8023_v2 = vld [vmem:[#allocation7 + $0x888] sm:$0xff]  }
 0x18f   : > { %7205 = vmatpush3.bf16.msra.mxu1 %v7975_v3  ;;  %7212 = vmatprep.subr.bf16.mxu0 %v7980_v9  ;;  %v8024_v3 = vld [vmem:[#allocation7 + $0x850] sm:$0xff]   ;;  %v8030_v9 = vld [vmem:[#allocation7 + $0x818] sm:$0xff]  }
 0x190   : > { %7234 = vmatprep.subr.bf16.mxu1 %v7981_v11  ;;  %v8032_v11 = vld [vmem:[#allocation7 + $0x860] sm:$0xff]  }
 0x191   : > { %5223 = vmatmul.mubr.bf16.vlgmr.msra.gmra.mrb[24].mxu0 %v6336_v6  ;;  %v8027_v6 = vld [vmem:[#allocation7 + $0x890] sm:$0xff]  }
 0x192   : > { %5263 = vmatmul.mubr.bf16.vlgmr.msra.gmra.mrb[24].mxu1 %v6338_v8  ;;  %7213 = vmatpush3.bf16.msra.mxu0 %v7982_v12  ;;  %v8029_v8 = vld [vmem:[#allocation7 + $0x8d8] sm:$0xff]   ;;  %v8033_v12 = vld [vmem:[#allocation7 + $0x8e0] sm:$0xff]  }
 0x193   : > { %7235 = vmatpush3.bf16.msra.mxu1 %v7983_v13  ;;  %7214 = vmatprep.subr.bf16.mxu0 %v7984_v14  ;;  %v8034_v13 = vld [vmem:[#allocation7 + $0x820] sm:$0xff]  }
 0x194   : > { %7236 = vmatprep.subr.bf16.mxu1 %v7985_v15  ;;  %5302 = vmatprep.mubr.bf16.mxu0 %v6341_v56  ;;  %v8035_v15 = vld [vmem:[#allocation7 + $0x8a0] sm:$0xff]   ;;  %v8063_v56 = vld [vmem:[#allocation7 + $0x990] sm:$0xff]  }
 0x195   : > { %5342 = vmatprep.mubr.bf16.mxu1 %v6343_v59  ;;  %v8066_v59 = vld [vmem:[#allocation7 + $0x918] sm:$0xff]  }
 0x196   : > { %7215 = vmatpush3.bf16.msra.mxu0 %v7986_v16 }
 0x197   : > { %7237 = vmatpush3.bf16.msra.mxu1 %v7987_v17  ;;  %7216 = vmatprep.subr.bf16.mxu0 %v7988_v18  ;;  %v8036_v18 = vld [vmem:[#allocation7 + $0x868] sm:$0xff]  }
 0x198   : > { %7238 = vmatprep.subr.bf16.mxu1 %v7989_v19 }
 0x19a   : > { %7217 = vmatpush3.bf16.msra.mxu0 %v7990_v20 }
 0x19b   : > { %7239 = vmatpush3.bf16.msra.mxu1 %v7991_v21  ;;  %7218 = vmatprep.subr.bf16.mxu0 %v7992_v22  ;;  %v8037_v21 = vld [vmem:[#allocation7 + $0x8e8] sm:$0xff]  }
 0x19c   : > { %7240 = vmatprep.subr.bf16.mxu1 %v7993_v23 }
 0x19e   : > { %7219 = vmatpush3.bf16.msra.mxu0 %v7994_v24 }
 0x19f   : > { %7241 = vmatpush3.bf16.msra.mxu1 %v7995_v25  ;;  %7220 = vmatprep.subr.bf16.mxu0 %v7996_v26  ;;  %v8038_v26 = vld [vmem:[#allocation7 + $0x828] sm:$0xff]  }
 0x1a0   : > { %7242 = vmatprep.subr.bf16.mxu1 %v7997_v27 }
 0x1a2   : > { %7221 = vmatpush3.bf16.msra.mxu0 %v7998_v28  ;;  %v8039_v28 = vld [vmem:[#allocation7 + $0x8a8] sm:$0xff]  }
 0x1a3   : > { %7243 = vmatpush3.bf16.msra.mxu1 %v7999_v30  ;;  %7222 = vmatprep.subr.bf16.mxu0 %v8000_v33  ;;  %v8042_v33 = vld [vmem:[#allocation7 + $0x830] sm:$0xff]  }
 0x1a4   : > { %v6920_v29 = vpop.f32.mrb[0].mxu0  ;;  %7244 = vmatprep.subr.bf16.mxu1 %v8001_v36  ;;  %v8045_v36 = vld [vmem:[#allocation7 + $0x8f8] sm:$0xff]  }
 0x1a5   : > { %v6942_v31 = vpop.f32.mrb[0].mxu1  ;;  %v6921_v32 = vpop.f32.mrb[1].mxu0 }
 0x1a6   : > { %v6922_v34 = vadd.f32 %v6921_v32, %v6920_v29  ;;  %v6943_v35 = vpop.f32.mrb[1].mxu1  ;;  %v6923_v38 = vpop.f32.mrb[2].mxu0  ;;  %7223 = vmatpush3.bf16.msra.mxu0 %v8002_v40  ;;  %v8041_v32 = vld [vmem:[#allocation7 + $0x8f0] sm:$0xff]   ;;  %v375_v40 = vld [vmem:[%s8842_s20 + $0x88] sm:$0xff] }
 0x1a7   : > { %v6944_v37 = vadd.f32 %v6943_v35, %v6942_v31  ;;  %v6945_v39 = vpop.f32.mrb[2].mxu1  ;;  %v6924_v41 = vpop.f32.mrb[3].mxu0  ;;  %7245 = vmatpush3.bf16.msra.mxu1 %v8003_v43  ;;  %7224 = vmatprep.subr.bf16.mxu0 %v8004_v45  ;;  %v8040_v31 = vld [vmem:[#allocation7 + $0x870] sm:$0xff]   ;;  %v8044_v35 = vld [vmem:[#allocation7 + $0x878] sm:$0xff]   ;;  %v6346_v43 = vcombine.low %v375_v40, %v375_v40  ;;  %v6347_v45 = vcombine.high %v375_v40, %v375_v40 }
 0x1a8   : > { %v6946_v44 = vpop.f32.mrb[3].mxu1  ;;  %7246 = vmatprep.subr.bf16.mxu1 %v8005_v46  ;;  %v8047_v38 = vld [vmem:[#allocation7 + $0x8b8] sm:$0xff]   ;;  %v374_v39 = vld [vmem:[%s8842_s20 + $0x80] sm:$0xff]  ;;  %v8053_v46 = vld [vmem:[#allocation7 + $0x9c0] sm:$0xff]  }
 0x1a9   : > { %v8879_v42 = vadd.f32 %v6944_v37, %v6922_v34  ;;  %v8043_v34 = vld [vmem:[#allocation7 + $0x8b0] sm:$0xff]   ;;  %v8046_v37 = vld [vmem:[#allocation7 + $0x838] sm:$0xff]   ;;  %v6344_v41 = vcombine.low %v374_v39, %v374_v39  ;;  %v8052_v44 = vld [vmem:[#allocation7 + $0x940] sm:$0xff]  }
 0x1aa   : > { %7225 = vmatpush3.bf16.msra.mxu0 %v8006_v47  ;;  %v8054_v47 = vld [vmem:[#allocation7 + $0x900] sm:$0xff]   ;;  %v8097_v40 = vld [vmem:[#allocation7 + $0xad0] sm:$0xff]  }
 0x1ab   : > { %7247 = vmatpush3.bf16.msra.mxu1 %v8007_v48  ;;  %7226 = vmatprep.subr.bf16.mxu0 %v8008_v49  ;;  %v8055_v48 = vld [vmem:[#allocation7 + $0x980] sm:$0xff]   ;;  %v8056_v49 = vld [vmem:[#allocation7 + $0x948] sm:$0xff]  }
 0x1ac   : > { %7248 = vmatprep.subr.bf16.mxu1 %v8009_v50  ;;  %v8057_v50 = vld [vmem:[#allocation7 + $0x9c8] sm:$0xff]  }
 0x1ae   : > { %7227 = vmatpush3.bf16.msra.mxu0 %v8010_v51  ;;  %v8058_v51 = vld [vmem:[#allocation7 + $0x908] sm:$0xff]  }
 0x1af   : > { %7249 = vmatpush3.bf16.msra.mxu1 %v8011_v52  ;;  %7256 = vmatprep.subr.bf16.mxu0 %v8016_v58  ;;  %v8059_v52 = vld [vmem:[#allocation7 + $0x988] sm:$0xff]   ;;  %v8065_v58 = vld [vmem:[#allocation7 + $0x9d8] sm:$0xff]  }
 0x1b0   : > { %7278 = vmatprep.subr.bf16.mxu1 %v8017_v60  ;;  %v8067_v60 = vld [vmem:[#allocation7 + $0x998] sm:$0xff]  }
 0x1b1   : > { %5303 = vmatmul.mubr.bf16.vlgmr.msra.gmra.mrb[28].mxu0 %v6340_v55  ;;  %v8062_v55 = vld [vmem:[#allocation7 + $0x910] sm:$0xff]  }
 0x1b2   : > { %5343 = vmatmul.mubr.bf16.vlgmr.msra.gmra.mrb[28].mxu1 %v6342_v57  ;;  %7257 = vmatpush3.bf16.msra.mxu0 %v8018_v61  ;;  %v8064_v57 = vld [vmem:[#allocation7 + $0x958] sm:$0xff]   ;;  %v8068_v61 = vld [vmem:[#allocation7 + $0x960] sm:$0xff]  }
 0x1b3   : > { %7279 = vmatpush3.bf16.msra.mxu1 %v8019_v62  ;;  %7258 = vmatprep.subr.bf16.mxu0 %v8020_v63  ;;  %v8069_v62 = vld [vmem:[#allocation7 + $0x9e0] sm:$0xff]  }
 0x1b4   : > { %7280 = vmatprep.subr.bf16.mxu1 %v8021_v0  ;;  %5422 = vmatprep.mubr.bf16.mxu1 %v6347_v45  ;;  %v8070_v0 = vld [vmem:[#allocation7 + $0x920] sm:$0xff]   ;;  %v8102_v45 = vld [vmem:[#allocation7 + $0xa18] sm:$0xff]  }
 0x1b6   : > { %7259 = vmatpush3.bf16.msra.mxu0 %v8022_v1 }
 0x1b7   : > { %7281 = vmatpush3.bf16.msra.mxu1 %v8023_v2  ;;  %7260 = vmatprep.subr.bf16.mxu0 %v8024_v3  ;;  %v8071_v2 = vld [vmem:[#allocation7 + $0x9a0] sm:$0xff]  }
 0x1b8   : > { %7282 = vmatprep.subr.bf16.mxu1 %v8025_v4 }
 0x1ba   : > { %7261 = vmatpush3.bf16.msra.mxu0 %v8026_v5  ;;  %v8072_v5 = vld [vmem:[#allocation7 + $0x968] sm:$0xff]  }
 0x1bb   : > { %7283 = vmatpush3.bf16.msra.mxu1 %v8027_v6  ;;  %7262 = vmatprep.subr.bf16.mxu0 %v8028_v7 }
 0x1bc   : > { %7284 = vmatprep.subr.bf16.mxu1 %v8029_v8  ;;  %v8073_v8 = vld [vmem:[#allocation7 + $0x9e8] sm:$0xff]  }
 0x1be   : > { %7263 = vmatpush3.bf16.msra.mxu0 %v8030_v9 }
 0x1bf   : > { %7285 = vmatpush3.bf16.msra.mxu1 %v8031_v10  ;;  %7264 = vmatprep.subr.bf16.mxu0 %v8032_v11  ;;  %v8074_v11 = vld [vmem:[#allocation7 + $0x928] sm:$0xff]  }
 0x1c0   : > { %7286 = vmatprep.subr.bf16.mxu1 %v8033_v12 }
 0x1c2   : > { %7265 = vmatpush3.bf16.msra.mxu0 %v8034_v13  ;;  %v8075_v13 = vld [vmem:[#allocation7 + $0x9a8] sm:$0xff]  }
 0x1c3   : > { %7287 = vmatpush3.bf16.msra.mxu1 %v8035_v15  ;;  %7266 = vmatprep.subr.bf16.mxu0 %v8036_v18  ;;  %v8077_v18 = vld [vmem:[#allocation7 + $0x9f0] sm:$0xff]  }
 0x1c4   : > { %v6964_v14 = vpop.f32.mrb[4].mxu0  ;;  %7288 = vmatprep.subr.bf16.mxu1 %v8037_v21  ;;  %v8080_v21 = vld [vmem:[#allocation7 + $0x978] sm:$0xff]  }
 0x1c5   : > { %v6986_v16 = vpop.f32.mrb[4].mxu1  ;;  %v6965_v17 = vpop.f32.mrb[5].mxu0 }
 0x1c6   : > { %v6966_v19 = vadd.f32 %v6965_v17, %v6964_v14  ;;  %v6987_v20 = vpop.f32.mrb[5].mxu1  ;;  %v6967_v23 = vpop.f32.mrb[6].mxu0  ;;  %7267 = vmatpush3.bf16.msra.mxu0 %v8038_v26 }
 0x1c7   : > { %v6988_v22 = vadd.f32 %v6987_v20, %v6986_v16  ;;  %v6989_v24 = vpop.f32.mrb[6].mxu1  ;;  %v6968_v27 = vpop.f32.mrb[7].mxu0  ;;  %7289 = vmatpush3.bf16.msra.mxu1 %v8039_v28  ;;  %7268 = vmatprep.subr.bf16.mxu0 %v8040_v31  ;;  %v8076_v16 = vld [vmem:[#allocation7 + $0x970] sm:$0xff]   ;;  %v8082_v23 = vld [vmem:[#allocation7 + $0x938] sm:$0xff]   ;;  %v377_v28 = vld [vmem:[%s8842_s20 + $0x98] sm:$0xff] }
 0x1c8   : > { %v4825_v25 = vadd.f32 %v6966_v19, %v8879_v42  ;;  %v6990_v29 = vpop.f32.mrb[7].mxu1  ;;  %7290 = vmatprep.subr.bf16.mxu1 %v8041_v32  ;;  %v6345_v42 = vcombine.high %v374_v39, %v374_v39  ;;  %v8078_v19 = vld [vmem:[#allocation7 + $0x930] sm:$0xff]   ;;  %v8083_v24 = vld [vmem:[#allocation7 + $0x9b8] sm:$0xff]   ;;  %v8088_v31 = vld [vmem:[#allocation7 + $0xa40] sm:$0xff]  }
 0x1c9   : > { %v8079_v20 = vld [vmem:[#allocation7 + $0x9b0] sm:$0xff]   ;;  %v6350_v29 = vcombine.low %v377_v28, %v377_v28  ;;  %v8089_v32 = vld [vmem:[#allocation7 + $0xac0] sm:$0xff]  }
 0x1ca   : > { %v8884_v30 = vadd.f32 %v6988_v22, %v4825_v25  ;;  %7269 = vmatpush3.bf16.msra.mxu0 %v8042_v33  ;;  %5382 = vmatprep.mubr.bf16.mxu0 %v6345_v42  ;;  %v8081_v22 = vld [vmem:[#allocation7 + $0x9f8] sm:$0xff]   ;;  %v376_v25 = vld [vmem:[%s8842_s20 + $0x90] sm:$0xff]  ;;  %v8096_v39 = vld [vmem:[#allocation7 + $0xa50] sm:$0xff]  }
 0x1cb   : > { %7291 = vmatpush3.bf16.msra.mxu1 %v8043_v34  ;;  %7270 = vmatprep.subr.bf16.mxu0 %v8044_v35  ;;  %v6348_v26 = vcombine.low %v376_v25, %v376_v25  ;;  %v6349_v27 = vcombine.high %v376_v25, %v376_v25  ;;  %v8090_v33 = vld [vmem:[#allocation7 + $0xa00] sm:$0xff]   ;;  %v8092_v35 = vld [vmem:[#allocation7 + $0xa48] sm:$0xff]   ;;  %v8099_v42 = vld [vmem:[#allocation7 + $0xa90] sm:$0xff]  }
 0x1cc   : > { %7292 = vmatprep.subr.bf16.mxu1 %v8045_v36  ;;  %v8091_v34 = vld [vmem:[#allocation7 + $0xa80] sm:$0xff]   ;;  %v8093_v36 = vld [vmem:[#allocation7 + $0xac8] sm:$0xff]   ;;  %v8132_v25 = vld [vmem:[#allocation7 + $0xb50] sm:$0xff]  }
 0x1ce   : > { %7271 = vmatpush3.bf16.msra.mxu0 %v8046_v37  ;;  %v8094_v37 = vld [vmem:[#allocation7 + $0xa08] sm:$0xff]  }
 0x1cf   : > { %7293 = vmatpush3.bf16.msra.mxu1 %v8047_v38  ;;  %7300 = vmatprep.subr.bf16.mxu0 %v8052_v44  ;;  %v8095_v38 = vld [vmem:[#allocation7 + $0xa88] sm:$0xff]   ;;  %v8101_v44 = vld [vmem:[#allocation7 + $0xad8] sm:$0xff]  }
 0x1d0   : > { %7322 = vmatprep.subr.bf16.mxu1 %v8053_v46  ;;  %v8103_v46 = vld [vmem:[#allocation7 + $0xa98] sm:$0xff]  }
 0x1d1   : > { %5383 = vmatmul.mubr.bf16.vlgmr.msra.gmra.mrb[32].mxu0 %v6344_v41  ;;  %v8098_v41 = vld [vmem:[#allocation7 + $0xa10] sm:$0xff]  }
 0x1d2   : > { %5423 = vmatmul.mubr.bf16.vlgmr.msra.gmra.mrb[32].mxu1 %v6346_v43  ;;  %7301 = vmatpush3.bf16.msra.mxu0 %v8054_v47  ;;  %v8100_v43 = vld [vmem:[#allocation7 + $0xa58] sm:$0xff]   ;;  %v8104_v47 = vld [vmem:[#allocation7 + $0xa60] sm:$0xff]  }
 0x1d3   : > { %7323 = vmatpush3.bf16.msra.mxu1 %v8055_v48  ;;  %7302 = vmatprep.subr.bf16.mxu0 %v8056_v49  ;;  %v8105_v48 = vld [vmem:[#allocation7 + $0xae0] sm:$0xff]  }
 0x1d4   : > { %7324 = vmatprep.subr.bf16.mxu1 %v8057_v50  ;;  %5462 = vmatprep.mubr.bf16.mxu0 %v6349_v27  ;;  %v8106_v50 = vld [vmem:[#allocation7 + $0xa20] sm:$0xff]   ;;  %v8134_v27 = vld [vmem:[#allocation7 + $0xb10] sm:$0xff]  }
 0x1d6   : > { %7303 = vmatpush3.bf16.msra.mxu0 %v8058_v51 }
 0x1d7   : > { %7325 = vmatpush3.bf16.msra.mxu1 %v8059_v52  ;;  %7304 = vmatprep.subr.bf16.mxu0 %v8060_v53  ;;  %v8107_v52 = vld [vmem:[#allocation7 + $0xaa0] sm:$0xff]  }
 0x1d8   : > { %7326 = vmatprep.subr.bf16.mxu1 %v8061_v54 }
 0x1da   : > { %7305 = vmatpush3.bf16.msra.mxu0 %v8062_v55  ;;  %v8108_v55 = vld [vmem:[#allocation7 + $0xa68] sm:$0xff]  }
 0x1db   : > { %7327 = vmatpush3.bf16.msra.mxu1 %v8063_v56  ;;  %7306 = vmatprep.subr.bf16.mxu0 %v8064_v57 }
 0x1dc   : > { %7328 = vmatprep.subr.bf16.mxu1 %v8065_v58  ;;  %v8109_v58 = vld [vmem:[#allocation7 + $0xae8] sm:$0xff]  }
 0x1de   : > { %7307 = vmatpush3.bf16.msra.mxu0 %v8066_v59 }
 0x1df   : > { %7329 = vmatpush3.bf16.msra.mxu1 %v8067_v60  ;;  %7308 = vmatprep.subr.bf16.mxu0 %v8068_v61  ;;  %v8110_v61 = vld [vmem:[#allocation7 + $0xa28] sm:$0xff]  }
 0x1e0   : > { %7330 = vmatprep.subr.bf16.mxu1 %v8069_v62 }
 0x1e2   : > { %7309 = vmatpush3.bf16.msra.mxu0 %v8070_v0 }
 0x1e3   : > { %7331 = vmatpush3.bf16.msra.mxu1 %v8071_v2  ;;  %7310 = vmatprep.subr.bf16.mxu0 %v8072_v5  ;;  %v8112_v2 = vld [vmem:[#allocation7 + $0xa70] sm:$0xff]  }
 0x1e4   : > { %v7008_v63 = vpop.f32.mrb[8].mxu0  ;;  %7332 = vmatprep.subr.bf16.mxu1 %v8073_v8  ;;  %v8114_v5 = vld [vmem:[#allocation7 + $0xa30] sm:$0xff]   ;;  %v8117_v8 = vld [vmem:[#allocation7 + $0xaf8] sm:$0xff]  }
 0x1e5   : > { %v7030_v1 = vpop.f32.mrb[8].mxu1  ;;  %v7009_v3 = vpop.f32.mrb[9].mxu0 }
 0x1e6   : > { %v7031_v4 = vpop.f32.mrb[9].mxu1  ;;  %v7010_v6 = vadd.f32 %v7009_v3, %v7008_v63  ;;  %v7011_v9 = vpop.f32.mrb[10].mxu0  ;;  %7311 = vmatpush3.bf16.msra.mxu0 %v8074_v11  ;;  %v8111_v63 = vld [vmem:[#allocation7 + $0xaa8] sm:$0xff]   ;;  %v378_v11 = vld [vmem:[%s8842_s20 + $0xa0] sm:$0xff] }
 0x1e7   : > { %v7032_v7 = vadd.f32 %v7031_v4, %v7030_v1  ;;  %v7033_v10 = vpop.f32.mrb[10].mxu1  ;;  %v7012_v14 = vpop.f32.mrb[11].mxu0  ;;  %7333 = vmatpush3.bf16.msra.mxu1 %v8075_v13  ;;  %7312 = vmatprep.subr.bf16.mxu0 %v8076_v16  ;;  %v8113_v4 = vld [vmem:[#allocation7 + $0xaf0] sm:$0xff]   ;;  %v8118_v9 = vld [vmem:[#allocation7 + $0xa38] sm:$0xff]   ;;  %v6352_v13 = vcombine.low %v378_v11, %v378_v11 }
 0x1e8   : > { %v4905_v12 = vadd.f32 %v7010_v6, %v8884_v30  ;;  %v7034_v15 = vpop.f32.mrb[11].mxu1  ;;  %7334 = vmatprep.subr.bf16.mxu1 %v8077_v18  ;;  %v6351_v30 = vcombine.high %v377_v28, %v377_v28  ;;  %v8115_v6 = vld [vmem:[#allocation7 + $0xab0] sm:$0xff]   ;;  %v8119_v10 = vld [vmem:[#allocation7 + $0xab8] sm:$0xff]   ;;  %v6353_v14 = vcombine.high %v378_v11, %v378_v11  ;;  %v8125_v18 = vld [vmem:[#allocation7 + $0xbc0] sm:$0xff]  }
 0x1e9   : > { %v8135_v28 = vld [vmem:[#allocation7 + $0xb90] sm:$0xff]  }
 0x1ea   : > { %v8889_v17 = vadd.f32 %v7032_v7, %v4905_v12  ;;  %7313 = vmatpush3.bf16.msra.mxu0 %v8078_v19  ;;  %5502 = vmatprep.mubr.bf16.mxu1 %v6351_v30  ;;  %v8116_v7 = vld [vmem:[#allocation7 + $0xa78] sm:$0xff]   ;;  %v8126_v19 = vld [vmem:[#allocation7 + $0xb00] sm:$0xff]   ;;  %v8168_v11 = vld [vmem:[#allocation7 + $0xc50] sm:$0xff]  }
 0x1eb   : > { %7335 = vmatpush3.bf16.msra.mxu1 %v8079_v20  ;;  %7314 = vmatprep.subr.bf16.mxu0 %v8080_v21  ;;  %v379_v12 = vld [vmem:[%s8842_s20 + $0xa8] sm:$0xff]  ;;  %v8127_v20 = vld [vmem:[#allocation7 + $0xb80] sm:$0xff]   ;;  %v8128_v21 = vld [vmem:[#allocation7 + $0xb48] sm:$0xff]  }
 0x1ec   : > { %7336 = vmatprep.subr.bf16.mxu1 %v8081_v22  ;;  %v6354_v15 = vcombine.low %v379_v12, %v379_v12  ;;  %v6355_v16 = vcombine.high %v379_v12, %v379_v12  ;;  %v8129_v22 = vld [vmem:[#allocation7 + $0xbc8] sm:$0xff]   ;;  %v8137_v30 = vld [vmem:[#allocation7 + $0xbd8] sm:$0xff]   ;;  %v8169_v12 = vld [vmem:[#allocation7 + $0xcd0] sm:$0xff]  }
 0x1ee   : > { %7315 = vmatpush3.bf16.msra.mxu0 %v8082_v23  ;;  %v8130_v23 = vld [vmem:[#allocation7 + $0xb08] sm:$0xff]  }
 0x1ef   : > { %7337 = vmatpush3.bf16.msra.mxu1 %v8083_v24  ;;  %7344 = vmatprep.subr.bf16.mxu0 %v8088_v31  ;;  %v8131_v24 = vld [vmem:[#allocation7 + $0xb88] sm:$0xff]   ;;  %v8138_v31 = vld [vmem:[#allocation7 + $0xb18] sm:$0xff]  }
 0x1f0   : > { %7366 = vmatprep.subr.bf16.mxu1 %v8089_v32  ;;  %v8139_v32 = vld [vmem:[#allocation7 + $0xb98] sm:$0xff]  }
 0x1f1   : > { %5463 = vmatmul.mubr.bf16.vlgmr.msra.gmra.mrb[36].mxu0 %v6348_v26  ;;  %v8133_v26 = vld [vmem:[#allocation7 + $0xbd0] sm:$0xff]  }
 0x1f2   : > { %5503 = vmatmul.mubr.bf16.vlgmr.msra.gmra.mrb[36].mxu1 %v6350_v29  ;;  %7345 = vmatpush3.bf16.msra.mxu0 %v8090_v33  ;;  %v8136_v29 = vld [vmem:[#allocation7 + $0xb58] sm:$0xff]   ;;  %v8140_v33 = vld [vmem:[#allocation7 + $0xb60] sm:$0xff]  }
 0x1f3   : > { %7367 = vmatpush3.bf16.msra.mxu1 %v8091_v34  ;;  %7346 = vmatprep.subr.bf16.mxu0 %v8092_v35  ;;  %v8141_v34 = vld [vmem:[#allocation7 + $0xbe0] sm:$0xff]  }
 0x1f4   : > { %7368 = vmatprep.subr.bf16.mxu1 %v8093_v36  ;;  %5542 = vmatprep.mubr.bf16.mxu0 %v6353_v14  ;;  %v8142_v35 = vld [vmem:[#allocation7 + $0xb20] sm:$0xff]   ;;  %v8171_v14 = vld [vmem:[#allocation7 + $0xc90] sm:$0xff]  }
 0x1f5   : > { %5582 = vmatprep.mubr.bf16.mxu1 %v6355_v16  ;;  %v8173_v16 = vld [vmem:[#allocation7 + $0xcd8] sm:$0xff]  }
 0x1f6   : > { %7347 = vmatpush3.bf16.msra.mxu0 %v8094_v37  ;;  %v8143_v37 = vld [vmem:[#allocation7 + $0xba0] sm:$0xff]  }
 0x1f7   : > { %7369 = vmatpush3.bf16.msra.mxu1 %v8095_v38  ;;  %7348 = vmatprep.subr.bf16.mxu0 %v8096_v39 }
 0x1f8   : > { %7370 = vmatprep.subr.bf16.mxu1 %v8097_v40 }
 0x1fa   : > { %7349 = vmatpush3.bf16.msra.mxu0 %v8098_v41 }
 0x1fb   : > { %7371 = vmatpush3.bf16.msra.mxu1 %v8099_v42  ;;  %7350 = vmatprep.subr.bf16.mxu0 %v8100_v43  ;;  %v8144_v43 = vld [vmem:[#allocation7 + $0xb68] sm:$0xff]  }
 0x1fc   : > { %7372 = vmatprep.subr.bf16.mxu1 %v8101_v44 }
 0x1fe   : > { %7351 = vmatpush3.bf16.msra.mxu0 %v8102_v45  ;;  %v8145_v45 = vld [vmem:[#allocation7 + $0xbe8] sm:$0xff]  }
 0x1ff   : > { %7373 = vmatpush3.bf16.msra.mxu1 %v8103_v46  ;;  %7352 = vmatprep.subr.bf16.mxu0 %v8104_v47 }
 0x200   : > { %7374 = vmatprep.subr.bf16.mxu1 %v8105_v48  ;;  %v8146_v48 = vld [vmem:[#allocation7 + $0xb28] sm:$0xff]  }
 0x202   : > { %7353 = vmatpush3.bf16.msra.mxu0 %v8106_v50  ;;  %v8147_v50 = vld [vmem:[#allocation7 + $0xba8] sm:$0xff]  }
 0x203   : > { %7375 = vmatpush3.bf16.msra.mxu1 %v8107_v52  ;;  %7354 = vmatprep.subr.bf16.mxu0 %v8108_v55  ;;  %v8150_v55 = vld [vmem:[#allocation7 + $0xb30] sm:$0xff]  }
 0x204   : > { %v7052_v49 = vpop.f32.mrb[12].mxu0  ;;  %7376 = vmatprep.subr.bf16.mxu1 %v8109_v58  ;;  %v8153_v58 = vld [vmem:[#allocation7 + $0xbf8] sm:$0xff]  }
 0x205   : > { %v7074_v51 = vpop.f32.mrb[12].mxu1  ;;  %v7053_v53 = vpop.f32.mrb[13].mxu0 }
 0x206   : > { %v7075_v54 = vpop.f32.mrb[13].mxu1  ;;  %v7054_v56 = vadd.f32 %v7053_v53, %v7052_v49  ;;  %v7055_v59 = vpop.f32.mrb[14].mxu0  ;;  %7355 = vmatpush3.bf16.msra.mxu0 %v8110_v61  ;;  %v8148_v53 = vld [vmem:[#allocation7 + $0xb70] sm:$0xff]   ;;  %v380_v61 = vld [vmem:[%s8842_s20 + $0xb0] sm:$0xff] }
 0x207   : > { %v7076_v57 = vadd.f32 %v7075_v54, %v7074_v51  ;;  %v7077_v60 = vpop.f32.mrb[14].mxu1  ;;  %v7056_v0 = vpop.f32.mrb[15].mxu0  ;;  %7377 = vmatpush3.bf16.msra.mxu1 %v8111_v63  ;;  %7356 = vmatprep.subr.bf16.mxu0 %v8112_v2  ;;  %v8149_v54 = vld [vmem:[#allocation7 + $0xbf0] sm:$0xff]   ;;  %v8154_v59 = vld [vmem:[#allocation7 + $0xb38] sm:$0xff]   ;;  %v6356_v63 = vcombine.low %v380_v61, %v380_v61 }
 0x208   : > { %v4985_v62 = vadd.f32 %v7054_v56, %v8889_v17  ;;  %v7078_v1 = vpop.f32.mrb[15].mxu1  ;;  %7378 = vmatprep.subr.bf16.mxu1 %v8113_v4  ;;  %v8124_v17 = vld [vmem:[#allocation7 + $0xb40] sm:$0xff]   ;;  %v8151_v56 = vld [vmem:[#allocation7 + $0xbb0] sm:$0xff]   ;;  %v8155_v60 = vld [vmem:[#allocation7 + $0xbb8] sm:$0xff]   ;;  %v6357_v0 = vcombine.high %v380_v61, %v380_v61 }
 0x209   : > { %v8161_v4 = vld [vmem:[#allocation7 + $0xcc0] sm:$0xff]   ;;  %v8204_v61 = vld [vmem:[#allocation7 + $0xd50] sm:$0xff]  }
 0x20a   : > { %v8894_v3 = vadd.f32 %v7076_v57, %v4985_v62  ;;  %7357 = vmatpush3.bf16.msra.mxu0 %v8114_v5  ;;  %v8152_v57 = vld [vmem:[#allocation7 + $0xb78] sm:$0xff]   ;;  %v381_v62 = vld [vmem:[%s8842_s20 + $0xb8] sm:$0xff]  ;;  %v8162_v5 = vld [vmem:[#allocation7 + $0xc00] sm:$0xff]  }
 0x20b   : > { %7379 = vmatpush3.bf16.msra.mxu1 %v8115_v6  ;;  %7358 = vmatprep.subr.bf16.mxu0 %v8116_v7  ;;  %v6358_v1 = vcombine.low %v381_v62, %v381_v62  ;;  %v6359_v2 = vcombine.high %v381_v62, %v381_v62  ;;  %v8163_v6 = vld [vmem:[#allocation7 + $0xc80] sm:$0xff]   ;;  %v8164_v7 = vld [vmem:[#allocation7 + $0xc48] sm:$0xff]   ;;  %v8205_v62 = vld [vmem:[#allocation7 + $0xdd0] sm:$0xff]  }
 0x20c   : > { %7380 = vmatprep.subr.bf16.mxu1 %v8117_v8  ;;  %v8165_v8 = vld [vmem:[#allocation7 + $0xcc8] sm:$0xff]  }
 0x20e   : > { %7359 = vmatpush3.bf16.msra.mxu0 %v8118_v9  ;;  %v8166_v9 = vld [vmem:[#allocation7 + $0xc08] sm:$0xff]  }
 0x20f   : > { %7381 = vmatpush3.bf16.msra.mxu1 %v8119_v10  ;;  %7388 = vmatprep.subr.bf16.mxu0 %v8124_v17  ;;  %v8167_v10 = vld [vmem:[#allocation7 + $0xc88] sm:$0xff]   ;;  %v8174_v17 = vld [vmem:[#allocation7 + $0xc18] sm:$0xff]  }
 0x210   : > { %7410 = vmatprep.subr.bf16.mxu1 %v8125_v18  ;;  %v8175_v18 = vld [vmem:[#allocation7 + $0xc98] sm:$0xff]  }
 0x211   : > { %5543 = vmatmul.mubr.bf16.vlgmr.msra.gmra.mrb[40].mxu0 %v6352_v13  ;;  %v8170_v13 = vld [vmem:[#allocation7 + $0xc10] sm:$0xff]  }
 0x212   : > { %5583 = vmatmul.mubr.bf16.vlgmr.msra.gmra.mrb[40].mxu1 %v6354_v15  ;;  %7389 = vmatpush3.bf16.msra.mxu0 %v8126_v19  ;;  %v8172_v15 = vld [vmem:[#allocation7 + $0xc58] sm:$0xff]   ;;  %v8176_v19 = vld [vmem:[#allocation7 + $0xc60] sm:$0xff]  }
 0x213   : > { %7411 = vmatpush3.bf16.msra.mxu1 %v8127_v20  ;;  %7390 = vmatprep.subr.bf16.mxu0 %v8128_v21  ;;  %v8177_v20 = vld [vmem:[#allocation7 + $0xce0] sm:$0xff]  }
 0x214   : > { %7412 = vmatprep.subr.bf16.mxu1 %v8129_v22  ;;  %5622 = vmatprep.mubr.bf16.mxu0 %v6357_v0  ;;  %v8178_v22 = vld [vmem:[#allocation7 + $0xc20] sm:$0xff]   ;;  %v8207_v0 = vld [vmem:[#allocation7 + $0xd90] sm:$0xff]  }
 0x215   : > { %5662 = vmatprep.mubr.bf16.mxu1 %v6359_v2  ;;  %v8209_v2 = vld [vmem:[#allocation7 + $0xdd8] sm:$0xff]  }
 0x216   : > { %7391 = vmatpush3.bf16.msra.mxu0 %v8130_v23 }
 0x217   : > { %7413 = vmatpush3.bf16.msra.mxu1 %v8131_v24  ;;  %7392 = vmatprep.subr.bf16.mxu0 %v8132_v25  ;;  %v8179_v24 = vld [vmem:[#allocation7 + $0xca0] sm:$0xff]  }
 0x218   : > { %7414 = vmatprep.subr.bf16.mxu1 %v8133_v26 }
 0x21a   : > { %7393 = vmatpush3.bf16.msra.mxu0 %v8134_v27 }
 0x21b   : > { %7415 = vmatpush3.bf16.msra.mxu1 %v8135_v28  ;;  %7394 = vmatprep.subr.bf16.mxu0 %v8136_v29  ;;  %v8180_v28 = vld [vmem:[#allocation7 + $0xc68] sm:$0xff]  }
 0x21c   : > { %7416 = vmatprep.subr.bf16.mxu1 %v8137_v30  ;;  %v8181_v30 = vld [vmem:[#allocation7 + $0xce8] sm:$0xff]  }
 0x21e   : > { %7395 = vmatpush3.bf16.msra.mxu0 %v8138_v31 }
 0x21f   : > { %7417 = vmatpush3.bf16.msra.mxu1 %v8139_v32  ;;  %7396 = vmatprep.subr.bf16.mxu0 %v8140_v33 }
 0x220   : > { %7418 = vmatprep.subr.bf16.mxu1 %v8141_v34  ;;  %v8182_v34 = vld [vmem:[#allocation7 + $0xc28] sm:$0xff]  }
 0x222   : > { %7397 = vmatpush3.bf16.msra.mxu0 %v8142_v35  ;;  %v8183_v35 = vld [vmem:[#allocation7 + $0xca8] sm:$0xff]  }
 0x223   : > { %7419 = vmatpush3.bf16.msra.mxu1 %v8143_v37  ;;  %7398 = vmatprep.subr.bf16.mxu0 %v8144_v43  ;;  %v8188_v43 = vld [vmem:[#allocation7 + $0xc78] sm:$0xff]  }
 0x224   : > { %v7096_v36 = vpop.f32.mrb[16].mxu0  ;;  %7420 = vmatprep.subr.bf16.mxu1 %v8145_v45  ;;  %v8190_v45 = vld [vmem:[#allocation7 + $0xc38] sm:$0xff]  }
 0x225   : > { %v7118_v38 = vpop.f32.mrb[16].mxu1  ;;  %v7097_v39 = vpop.f32.mrb[17].mxu0 }
 0x226   : > { %v7119_v40 = vpop.f32.mrb[17].mxu1  ;;  %v7098_v41 = vadd.f32 %v7097_v39, %v7096_v36  ;;  %v7099_v44 = vpop.f32.mrb[18].mxu0  ;;  %7399 = vmatpush3.bf16.msra.mxu0 %v8146_v48  ;;  %v8184_v39 = vld [vmem:[#allocation7 + $0xc70] sm:$0xff]   ;;  %v383_v48 = vld [vmem:[%s8842_s20 + $0xc8] sm:$0xff] }
 0x227   : > { %v7120_v42 = vadd.f32 %v7119_v40, %v7118_v38  ;;  %v7121_v46 = vpop.f32.mrb[18].mxu1  ;;  %v7100_v49 = vpop.f32.mrb[19].mxu0  ;;  %7421 = vmatpush3.bf16.msra.mxu1 %v8147_v50  ;;  %7400 = vmatprep.subr.bf16.mxu0 %v8148_v53  ;;  %v8185_v40 = vld [vmem:[#allocation7 + $0xcf0] sm:$0xff]   ;;  %v8189_v44 = vld [vmem:[#allocation7 + $0xcf8] sm:$0xff]   ;;  %v6363_v53 = vcombine.high %v383_v48, %v383_v48 }
 0x228   : > { %v5065_v47 = vadd.f32 %v7098_v41, %v8894_v3  ;;  %v7122_v51 = vpop.f32.mrb[19].mxu1  ;;  %7422 = vmatprep.subr.bf16.mxu1 %v8149_v54  ;;  %v8160_v3 = vld [vmem:[#allocation7 + $0xc40] sm:$0xff]   ;;  %v8186_v41 = vld [vmem:[#allocation7 + $0xc30] sm:$0xff]   ;;  %v8191_v46 = vld [vmem:[#allocation7 + $0xcb8] sm:$0xff]  }
 0x229   : > { %v6362_v51 = vcombine.low %v383_v48, %v383_v48  ;;  %v8197_v54 = vld [vmem:[#allocation7 + $0xdc0] sm:$0xff]   ;;  %v8241_v48 = vld [vmem:[#allocation7 + $0xed0] sm:$0xff]  }
 0x22a   : > { %v8899_v52 = vadd.f32 %v7120_v42, %v5065_v47  ;;  %7401 = vmatpush3.bf16.msra.mxu0 %v8150_v55  ;;  %v8187_v42 = vld [vmem:[#allocation7 + $0xcb0] sm:$0xff]   ;;  %v8198_v55 = vld [vmem:[#allocation7 + $0xd00] sm:$0xff]  }
 0x22b   : > { %7423 = vmatpush3.bf16.msra.mxu1 %v8151_v56  ;;  %7402 = vmatprep.subr.bf16.mxu0 %v8152_v57  ;;  %v382_v47 = vld [vmem:[%s8842_s20 + $0xc0] sm:$0xff]  ;;  %v8199_v56 = vld [vmem:[#allocation7 + $0xd80] sm:$0xff]   ;;  %v8200_v57 = vld [vmem:[#allocation7 + $0xd48] sm:$0xff]  }
 0x22c   : > { %7424 = vmatprep.subr.bf16.mxu1 %v8153_v58  ;;  %v6360_v49 = vcombine.low %v382_v47, %v382_v47  ;;  %v6361_v50 = vcombine.high %v382_v47, %v382_v47  ;;  %v8201_v58 = vld [vmem:[#allocation7 + $0xdc8] sm:$0xff]   ;;  %v8240_v47 = vld [vmem:[#allocation7 + $0xe50] sm:$0xff]  }
 0x22e   : > { %7403 = vmatpush3.bf16.msra.mxu0 %v8154_v59  ;;  %v8202_v59 = vld [vmem:[#allocation7 + $0xd08] sm:$0xff]  }
 0x22f   : > { %7425 = vmatpush3.bf16.msra.mxu1 %v8155_v60  ;;  %7432 = vmatprep.subr.bf16.mxu0 %v8160_v3  ;;  %v8203_v60 = vld [vmem:[#allocation7 + $0xd88] sm:$0xff]   ;;  %v8210_v3 = vld [vmem:[#allocation7 + $0xd18] sm:$0xff]  }
 0x230   : > { %7454 = vmatprep.subr.bf16.mxu1 %v8161_v4  ;;  %v8211_v4 = vld [vmem:[#allocation7 + $0xd98] sm:$0xff]  }
 0x231   : > { %5623 = vmatmul.mubr.bf16.vlgmr.msra.gmra.mrb[44].mxu0 %v6356_v63  ;;  %v8206_v63 = vld [vmem:[#allocation7 + $0xd10] sm:$0xff]  }
 0x232   : > { %5663 = vmatmul.mubr.bf16.vlgmr.msra.gmra.mrb[44].mxu1 %v6358_v1  ;;  %7433 = vmatpush3.bf16.msra.mxu0 %v8162_v5  ;;  %v8208_v1 = vld [vmem:[#allocation7 + $0xd58] sm:$0xff]   ;;  %v8212_v5 = vld [vmem:[#allocation7 + $0xd60] sm:$0xff]  }
 0x233   : > { %7455 = vmatpush3.bf16.msra.mxu1 %v8163_v6  ;;  %7434 = vmatprep.subr.bf16.mxu0 %v8164_v7  ;;  %v8213_v6 = vld [vmem:[#allocation7 + $0xde0] sm:$0xff]  }
 0x234   : > { %7456 = vmatprep.subr.bf16.mxu1 %v8165_v8  ;;  %5702 = vmatprep.mubr.bf16.mxu0 %v6361_v50  ;;  %v8214_v8 = vld [vmem:[#allocation7 + $0xd20] sm:$0xff]   ;;  %v8243_v50 = vld [vmem:[#allocation7 + $0xe90] sm:$0xff]  }
 0x235   : > { %5742 = vmatprep.mubr.bf16.mxu1 %v6363_v53  ;;  %v8246_v53 = vld [vmem:[#allocation7 + $0xe18] sm:$0xff]  }
 0x236   : > { %7435 = vmatpush3.bf16.msra.mxu0 %v8166_v9 }
 0x237   : > { %7457 = vmatpush3.bf16.msra.mxu1 %v8167_v10  ;;  %7436 = vmatprep.subr.bf16.mxu0 %v8168_v11  ;;  %v8215_v10 = vld [vmem:[#allocation7 + $0xda0] sm:$0xff]  }
 0x238   : > { %7458 = vmatprep.subr.bf16.mxu1 %v8169_v12 }
 0x23a   : > { %7437 = vmatpush3.bf16.msra.mxu0 %v8170_v13  ;;  %v8216_v13 = vld [vmem:[#allocation7 + $0xd68] sm:$0xff]  }
 0x23b   : > { %7459 = vmatpush3.bf16.msra.mxu1 %v8171_v14  ;;  %7438 = vmatprep.subr.bf16.mxu0 %v8172_v15 }
 0x23c   : > { %7460 = vmatprep.subr.bf16.mxu1 %v8173_v16  ;;  %v8217_v16 = vld [vmem:[#allocation7 + $0xde8] sm:$0xff]  }
 0x23e   : > { %7439 = vmatpush3.bf16.msra.mxu0 %v8174_v17 }
 0x23f   : > { %7461 = vmatpush3.bf16.msra.mxu1 %v8175_v18  ;;  %7440 = vmatprep.subr.bf16.mxu0 %v8176_v19  ;;  %v8218_v19 = vld [vmem:[#allocation7 + $0xd28] sm:$0xff]  }
 0x240   : > { %7462 = vmatprep.subr.bf16.mxu1 %v8177_v20 }
 0x242   : > { %7441 = vmatpush3.bf16.msra.mxu0 %v8178_v22 }
 0x243   : > { %7463 = vmatpush3.bf16.msra.mxu1 %v8179_v24  ;;  %7442 = vmatprep.subr.bf16.mxu0 %v8180_v28  ;;  %v8220_v24 = vld [vmem:[#allocation7 + $0xd70] sm:$0xff]  }
 0x244   : > { %v7140_v21 = vpop.f32.mrb[20].mxu0  ;;  %7464 = vmatprep.subr.bf16.mxu1 %v8181_v30  ;;  %v8223_v28 = vld [vmem:[#allocation7 + $0xdb0] sm:$0xff]   ;;  %v8225_v30 = vld [vmem:[#allocation7 + $0xdf8] sm:$0xff]  }
 0x245   : > { %v7162_v23 = vpop.f32.mrb[20].mxu1  ;;  %v7141_v25 = vpop.f32.mrb[21].mxu0 }
 0x246   : > { %v7142_v26 = vadd.f32 %v7141_v25, %v7140_v21  ;;  %v7163_v27 = vpop.f32.mrb[21].mxu1  ;;  %v7143_v31 = vpop.f32.mrb[22].mxu0  ;;  %7443 = vmatpush3.bf16.msra.mxu0 %v8182_v34  ;;  %v8219_v21 = vld [vmem:[#allocation7 + $0xda8] sm:$0xff]  }
 0x247   : > { %v7164_v29 = vadd.f32 %v7163_v27, %v7162_v23  ;;  %v7165_v33 = vpop.f32.mrb[22].mxu1  ;;  %v7144_v36 = vpop.f32.mrb[23].mxu0  ;;  %7465 = vmatpush3.bf16.msra.mxu1 %v8183_v35  ;;  %7444 = vmatprep.subr.bf16.mxu0 %v8184_v39  ;;  %v8222_v27 = vld [vmem:[#allocation7 + $0xd30] sm:$0xff]   ;;  %v8226_v31 = vld [vmem:[#allocation7 + $0xd38] sm:$0xff]   ;;  %v8232_v39 = vld [vmem:[#allocation7 + $0xe40] sm:$0xff]  }
 0x248   : > { %v5145_v32 = vadd.f32 %v7142_v26, %v8899_v52  ;;  %v7166_v38 = vpop.f32.mrb[23].mxu1  ;;  %7466 = vmatprep.subr.bf16.mxu1 %v8185_v40  ;;  %v8196_v52 = vld [vmem:[#allocation7 + $0xd40] sm:$0xff]   ;;  %v8221_v26 = vld [vmem:[#allocation7 + $0xdf0] sm:$0xff]   ;;  %v385_v36 = vld [vmem:[%s8842_s20 + $0xd8] sm:$0xff] }
 0x249   : > { %v384_v33 = vld [vmem:[%s8842_s20 + $0xd0] sm:$0xff]  ;;  %v6367_v38 = vcombine.high %v385_v36, %v385_v36 }
 0x24a   : > { %v8904_v37 = vadd.f32 %v7164_v29, %v5145_v32  ;;  %7445 = vmatpush3.bf16.msra.mxu0 %v8186_v41  ;;  %v8224_v29 = vld [vmem:[#allocation7 + $0xd78] sm:$0xff]   ;;  %v6364_v34 = vcombine.low %v384_v33, %v384_v33  ;;  %v6365_v35 = vcombine.high %v384_v33, %v384_v33  ;;  %v8233_v40 = vld [vmem:[#allocation7 + $0xec0] sm:$0xff]   ;;  %v8276_v33 = vld [vmem:[#allocation7 + $0xf50] sm:$0xff]  }
 0x24b   : > { %7467 = vmatpush3.bf16.msra.mxu1 %v8187_v42  ;;  %7446 = vmatprep.subr.bf16.mxu0 %v8188_v43  ;;  %v8227_v32 = vld [vmem:[#allocation7 + $0xdb8] sm:$0xff]   ;;  %v8234_v41 = vld [vmem:[#allocation7 + $0xe00] sm:$0xff]   ;;  %v8236_v43 = vld [vmem:[#allocation7 + $0xe48] sm:$0xff]  }
 0x24c   : > { %7468 = vmatprep.subr.bf16.mxu1 %v8189_v44  ;;  %v8235_v42 = vld [vmem:[#allocation7 + $0xe80] sm:$0xff]   ;;  %v8237_v44 = vld [vmem:[#allocation7 + $0xec8] sm:$0xff]  }
 0x24e   : > { %7447 = vmatpush3.bf16.msra.mxu0 %v8190_v45  ;;  %v8238_v45 = vld [vmem:[#allocation7 + $0xe08] sm:$0xff]  }
 0x24f   : > { %7469 = vmatpush3.bf16.msra.mxu1 %v8191_v46  ;;  %7476 = vmatprep.subr.bf16.mxu0 %v8196_v52  ;;  %v8239_v46 = vld [vmem:[#allocation7 + $0xe88] sm:$0xff]   ;;  %v8245_v52 = vld [vmem:[#allocation7 + $0xed8] sm:$0xff]  }
 0x250   : > { %7498 = vmatprep.subr.bf16.mxu1 %v8197_v54  ;;  %v8247_v54 = vld [vmem:[#allocation7 + $0xe98] sm:$0xff]  }
 0x251   : > { %5703 = vmatmul.mubr.bf16.vlgmr.msra.gmra.mrb[48].mxu0 %v6360_v49  ;;  %v8242_v49 = vld [vmem:[#allocation7 + $0xe10] sm:$0xff]  }
 0x252   : > { %5743 = vmatmul.mubr.bf16.vlgmr.msra.gmra.mrb[48].mxu1 %v6362_v51  ;;  %7477 = vmatpush3.bf16.msra.mxu0 %v8198_v55  ;;  %v8244_v51 = vld [vmem:[#allocation7 + $0xe58] sm:$0xff]   ;;  %v8248_v55 = vld [vmem:[#allocation7 + $0xe60] sm:$0xff]  }
 0x253   : > { %7499 = vmatpush3.bf16.msra.mxu1 %v8199_v56  ;;  %7478 = vmatprep.subr.bf16.mxu0 %v8200_v57  ;;  %v8249_v56 = vld [vmem:[#allocation7 + $0xee0] sm:$0xff]  }
 0x254   : > { %7500 = vmatprep.subr.bf16.mxu1 %v8201_v58  ;;  %5782 = vmatprep.mubr.bf16.mxu0 %v6365_v35  ;;  %v8250_v58 = vld [vmem:[#allocation7 + $0xe20] sm:$0xff]   ;;  %v8278_v35 = vld [vmem:[#allocation7 + $0xf10] sm:$0xff]  }
 0x255   : > { %5822 = vmatprep.mubr.bf16.mxu1 %v6367_v38  ;;  %v8281_v38 = vld [vmem:[#allocation7 + $0xfd8] sm:$0xff]  }
 0x256   : > { %7479 = vmatpush3.bf16.msra.mxu0 %v8202_v59 }
 0x257   : > { %7501 = vmatpush3.bf16.msra.mxu1 %v8203_v60  ;;  %7480 = vmatprep.subr.bf16.mxu0 %v8204_v61  ;;  %v8251_v60 = vld [vmem:[#allocation7 + $0xea0] sm:$0xff]  }
 0x258   : > { %7502 = vmatprep.subr.bf16.mxu1 %v8205_v62 }
 0x25a   : > { %7481 = vmatpush3.bf16.msra.mxu0 %v8206_v63  ;;  %v8252_v63 = vld [vmem:[#allocation7 + $0xe68] sm:$0xff]  }
 0x25b   : > { %7503 = vmatpush3.bf16.msra.mxu1 %v8207_v0  ;;  %7482 = vmatprep.subr.bf16.mxu0 %v8208_v1 }
 0x25c   : > { %7504 = vmatprep.subr.bf16.mxu1 %v8209_v2  ;;  %v8253_v2 = vld [vmem:[#allocation7 + $0xee8] sm:$0xff]  }
 0x25e   : > { %7483 = vmatpush3.bf16.msra.mxu0 %v8210_v3 }
 0x25f   : > { %7505 = vmatpush3.bf16.msra.mxu1 %v8211_v4  ;;  %7484 = vmatprep.subr.bf16.mxu0 %v8212_v5  ;;  %v8254_v5 = vld [vmem:[#allocation7 + $0xe28] sm:$0xff]  }
 0x260   : > { %7506 = vmatprep.subr.bf16.mxu1 %v8213_v6 }
 0x262   : > { %7485 = vmatpush3.bf16.msra.mxu0 %v8214_v8 }
 0x263   : > { %7507 = vmatpush3.bf16.msra.mxu1 %v8215_v10  ;;  %7486 = vmatprep.subr.bf16.mxu0 %v8216_v13  ;;  %v8256_v10 = vld [vmem:[#allocation7 + $0xe70] sm:$0xff]  }
 0x264   : > { %v7184_v7 = vpop.f32.mrb[24].mxu0  ;;  %7508 = vmatprep.subr.bf16.mxu1 %v8217_v16  ;;  %v8258_v13 = vld [vmem:[#allocation7 + $0xe30] sm:$0xff]   ;;  %v8261_v16 = vld [vmem:[#allocation7 + $0xef8] sm:$0xff]  }
 0x265   : > { %v7206_v9 = vpop.f32.mrb[24].mxu1  ;;  %v7185_v11 = vpop.f32.mrb[25].mxu0 }
 0x266   : > { %v7207_v12 = vpop.f32.mrb[25].mxu1  ;;  %v7186_v14 = vadd.f32 %v7185_v11, %v7184_v7  ;;  %v7187_v17 = vpop.f32.mrb[26].mxu0  ;;  %7487 = vmatpush3.bf16.msra.mxu0 %v8218_v19  ;;  %v8255_v7 = vld [vmem:[#allocation7 + $0xea8] sm:$0xff]   ;;  %v386_v19 = vld [vmem:[%s8842_s20 + $0xe0] sm:$0xff] }
 0x267   : > { %v7208_v15 = vadd.f32 %v7207_v12, %v7206_v9  ;;  %v7209_v18 = vpop.f32.mrb[26].mxu1  ;;  %v7188_v22 = vpop.f32.mrb[27].mxu0  ;;  %7509 = vmatpush3.bf16.msra.mxu1 %v8219_v21  ;;  %7488 = vmatprep.subr.bf16.mxu0 %v8220_v24  ;;  %v8257_v12 = vld [vmem:[#allocation7 + $0xef0] sm:$0xff]   ;;  %v8262_v17 = vld [vmem:[#allocation7 + $0xe38] sm:$0xff]   ;;  %v6368_v21 = vcombine.low %v386_v19, %v386_v19 }
 0x268   : > { %v5225_v20 = vadd.f32 %v7186_v14, %v8904_v37  ;;  %v7210_v23 = vpop.f32.mrb[27].mxu1  ;;  %7510 = vmatprep.subr.bf16.mxu1 %v8221_v26  ;;  %v6366_v37 = vcombine.low %v385_v36, %v385_v36  ;;  %v8259_v14 = vld [vmem:[#allocation7 + $0xeb0] sm:$0xff]   ;;  %v8263_v18 = vld [vmem:[#allocation7 + $0xeb8] sm:$0xff]   ;;  %v6369_v22 = vcombine.high %v386_v19, %v386_v19  ;;  %v8269_v26 = vld [vmem:[#allocation7 + $0xfc0] sm:$0xff]  }
 0x269   : > { %v8279_v36 = vld [vmem:[#allocation7 + $0xf90] sm:$0xff]  }
 0x26a   : > { %v8909_v25 = vadd.f32 %v7208_v15, %v5225_v20  ;;  %7489 = vmatpush3.bf16.msra.mxu0 %v8222_v27  ;;  %v8260_v15 = vld [vmem:[#allocation7 + $0xe78] sm:$0xff]   ;;  %v8270_v27 = vld [vmem:[#allocation7 + $0xf00] sm:$0xff]  }
 0x26b   : > { %7511 = vmatpush3.bf16.msra.mxu1 %v8223_v28  ;;  %7490 = vmatprep.subr.bf16.mxu0 %v8224_v29  ;;  %v387_v20 = vld [vmem:[%s8842_s20 + $0xe8] sm:$0xff]  ;;  %v8271_v28 = vld [vmem:[#allocation7 + $0xf80] sm:$0xff]   ;;  %v8272_v29 = vld [vmem:[#allocation7 + $0xf48] sm:$0xff]  }
 0x26c   : > { %7512 = vmatprep.subr.bf16.mxu1 %v8225_v30  ;;  %v6370_v23 = vcombine.low %v387_v20, %v387_v20  ;;  %v6371_v24 = vcombine.high %v387_v20, %v387_v20  ;;  %v8273_v30 = vld [vmem:[#allocation7 + $0xfc8] sm:$0xff]  }
 0x26e   : > { %7491 = vmatpush3.bf16.msra.mxu0 %v8226_v31  ;;  %v8274_v31 = vld [vmem:[#allocation7 + $0xf08] sm:$0xff]  }
 0x26f   : > { %7513 = vmatpush3.bf16.msra.mxu1 %v8227_v32  ;;  %7520 = vmatprep.subr.bf16.mxu0 %v8232_v39  ;;  %v8275_v32 = vld [vmem:[#allocation7 + $0xf88] sm:$0xff]   ;;  %v8282_v39 = vld [vmem:[#allocation7 + $0xf18] sm:$0xff]  }
 0x270   : > { %7542 = vmatprep.subr.bf16.mxu1 %v8233_v40  ;;  %v8283_v40 = vld [vmem:[#allocation7 + $0xf98] sm:$0xff]  }
 0x271   : > { %5783 = vmatmul.mubr.bf16.vlgmr.msra.gmra.mrb[52].mxu0 %v6364_v34  ;;  %v8277_v34 = vld [vmem:[#allocation7 + $0xfd0] sm:$0xff]  }
 0x272   : > { %5823 = vmatmul.mubr.bf16.vlgmr.msra.gmra.mrb[52].mxu1 %v6366_v37  ;;  %7521 = vmatpush3.bf16.msra.mxu0 %v8234_v41  ;;  %v8280_v37 = vld [vmem:[#allocation7 + $0xf58] sm:$0xff]   ;;  %v8284_v41 = vld [vmem:[#allocation7 + $0xf60] sm:$0xff]  }
 0x273   : > { %7543 = vmatpush3.bf16.msra.mxu1 %v8235_v42  ;;  %7522 = vmatprep.subr.bf16.mxu0 %v8236_v43  ;;  %v8285_v42 = vld [vmem:[#allocation7 + $0xfe0] sm:$0xff]  }
 0x274   : > { %7544 = vmatprep.subr.bf16.mxu1 %v8237_v44  ;;  %5862 = vmatprep.mubr.bf16.mxu0 %v6369_v22  ;;  %v8286_v43 = vld [vmem:[#allocation7 + $0xf20] sm:$0xff]  }
 0x275   : > { %5902 = vmatprep.mubr.bf16.mxu1 %v6371_v24 }
 0x276   : > { %7523 = vmatpush3.bf16.msra.mxu0 %v8238_v45  ;;  %v8287_v45 = vld [vmem:[#allocation7 + $0xfa0] sm:$0xff]  }
 0x277   : > { %7545 = vmatpush3.bf16.msra.mxu1 %v8239_v46  ;;  %7524 = vmatprep.subr.bf16.mxu0 %v8240_v47 }
 0x278   : > { %7546 = vmatprep.subr.bf16.mxu1 %v8241_v48 }
 0x27a   : > { %7525 = vmatpush3.bf16.msra.mxu0 %v8242_v49 }
 0x27b   : > { %7547 = vmatpush3.bf16.msra.mxu1 %v8243_v50  ;;  %7526 = vmatprep.subr.bf16.mxu0 %v8244_v51  ;;  %v8288_v51 = vld [vmem:[#allocation7 + $0xf68] sm:$0xff]  }
 0x27c   : > { %7548 = vmatprep.subr.bf16.mxu1 %v8245_v52 }
 0x27e   : > { %7527 = vmatpush3.bf16.msra.mxu0 %v8246_v53  ;;  %v8289_v53 = vld [vmem:[#allocation7 + $0xfe8] sm:$0xff]  }
 0x27f   : > { %7549 = vmatpush3.bf16.msra.mxu1 %v8247_v54  ;;  %7528 = vmatprep.subr.bf16.mxu0 %v8248_v55 }
 0x280   : > { %7550 = vmatprep.subr.bf16.mxu1 %v8249_v56  ;;  %v8290_v56 = vld [vmem:[#allocation7 + $0xf28] sm:$0xff]  }
 0x282   : > { %7529 = vmatpush3.bf16.msra.mxu0 %v8250_v58  ;;  %v8291_v58 = vld [vmem:[#allocation7 + $0xfa8] sm:$0xff]  }
 0x283   : > { %7551 = vmatpush3.bf16.msra.mxu1 %v8251_v60  ;;  %7530 = vmatprep.subr.bf16.mxu0 %v8252_v63  ;;  %v8294_v63 = vld [vmem:[#allocation7 + $0xf30] sm:$0xff]  }
 0x284   : > { %v7228_v57 = vpop.f32.mrb[28].mxu0  ;;  %7552 = vmatprep.subr.bf16.mxu1 %v8253_v2  ;;  %v8297_v2 = vld [vmem:[#allocation7 + $0xff8] sm:$0xff]  }
 0x285   : > { %v7250_v59 = vpop.f32.mrb[28].mxu1  ;;  %v7229_v61 = vpop.f32.mrb[29].mxu0 }
 0x286   : > { %v7251_v62 = vpop.f32.mrb[29].mxu1  ;;  %v7230_v0 = vadd.f32 %v7229_v61, %v7228_v57  ;;  %v7231_v3 = vpop.f32.mrb[30].mxu0  ;;  %7531 = vmatpush3.bf16.msra.mxu0 %v8254_v5  ;;  %v8292_v61 = vld [vmem:[#allocation7 + $0xf70] sm:$0xff]   ;;  %v388_v5 = vld [vmem:[%s8842_s20 + $0xf0] sm:$0xff] }
 0x287   : > { %v7252_v1 = vadd.f32 %v7251_v62, %v7250_v59  ;;  %v7253_v4 = vpop.f32.mrb[30].mxu1  ;;  %v7232_v8 = vpop.f32.mrb[31].mxu0  ;;  %7553 = vmatpush3.bf16.msra.mxu1 %v8255_v7  ;;  %7532 = vmatprep.subr.bf16.mxu0 %v8256_v10  ;;  %v8293_v62 = vld [vmem:[#allocation7 + $0xff0] sm:$0xff]   ;;  %v8298_v3 = vld [vmem:[#allocation7 + $0xf38] sm:$0xff]   ;;  %v6372_v7 = vcombine.low %v388_v5, %v388_v5 }
 0x288   : > { %v5305_v6 = vadd.f32 %v7230_v0, %v8909_v25  ;;  %v7254_v9 = vpop.f32.mrb[31].mxu1  ;;  %7554 = vmatprep.subr.bf16.mxu1 %v8257_v12  ;;  %v8268_v25 = vld [vmem:[#allocation7 + $0xf40] sm:$0xff]   ;;  %v8295_v0 = vld [vmem:[#allocation7 + $0xfb0] sm:$0xff]   ;;  %v8299_v4 = vld [vmem:[#allocation7 + $0xfb8] sm:$0xff]   ;;  %v6373_v8 = vcombine.high %v388_v5, %v388_v5 }
 0x28a   : > { %v8914_v11 = vadd.f32 %v7252_v1, %v5305_v6  ;;  %7533 = vmatpush3.bf16.msra.mxu0 %v8258_v13  ;;  %v8296_v1 = vld [vmem:[#allocation7 + $0xf78] sm:$0xff]   ;;  %v389_v6 = vld [vmem:[%s8842_s20 + $0xf8] sm:$0xff] }
 0x28b   : > { %7555 = vmatpush3.bf16.msra.mxu1 %v8259_v14  ;;  %7534 = vmatprep.subr.bf16.mxu0 %v8260_v15  ;;  %v6374_v9 = vcombine.low %v389_v6, %v389_v6  ;;  %v6375_v10 = vcombine.high %v389_v6, %v389_v6 }
 0x28c   : > { %7556 = vmatprep.subr.bf16.mxu1 %v8261_v16 }
 0x28e   : > { %7535 = vmatpush3.bf16.msra.mxu0 %v8262_v17 }
 0x28f   : > { %7557 = vmatpush3.bf16.msra.mxu1 %v8263_v18  ;;  %7564 = vmatprep.subr.bf16.mxu0 %v8268_v25 }
 0x290   : > { %7586 = vmatprep.subr.bf16.mxu1 %v8269_v26 }
 0x291   : > { %5863 = vmatmul.mubr.bf16.vlgmr.msra.gmra.mrb[56].mxu0 %v6368_v21 }
 0x292   : > { %5903 = vmatmul.mubr.bf16.vlgmr.msra.gmra.mrb[56].mxu1 %v6370_v23  ;;  %7565 = vmatpush3.bf16.msra.mxu0 %v8270_v27 }
 0x293   : > { %7587 = vmatpush3.bf16.msra.mxu1 %v8271_v28  ;;  %7566 = vmatprep.subr.bf16.mxu0 %v8272_v29 }
 0x294   : > { %7588 = vmatprep.subr.bf16.mxu1 %v8273_v30  ;;  %5942 = vmatprep.mubr.bf16.mxu0 %v6373_v8 }
 0x295   : > { %5982 = vmatprep.mubr.bf16.mxu1 %v6375_v10 }
 0x296   : > { %7567 = vmatpush3.bf16.msra.mxu0 %v8274_v31 }
 0x297   : > { %7589 = vmatpush3.bf16.msra.mxu1 %v8275_v32  ;;  %7568 = vmatprep.subr.bf16.mxu0 %v8276_v33 }
 0x298   : > { %7590 = vmatprep.subr.bf16.mxu1 %v8277_v34 }
 0x29a   : > { %7569 = vmatpush3.bf16.msra.mxu0 %v8278_v35  ;;  %v8304_v35 = vld [vmem:[#allocation8] sm:$0xff]  }
 0x29b   : > { %7591 = vmatpush3.bf16.msra.mxu1 %v8279_v36  ;;  %7570 = vmatprep.subr.bf16.mxu0 %v8280_v37  ;;  %v8577_v36 = vmov 0.0   ;;  %v8305_v37 = vld [vmem:[#allocation8 + $0x8] sm:$0xff]  }
 0x29c   : > { %7592 = vmatprep.subr.bf16.mxu1 %v8281_v38 }
 0x29e   : > { %7571 = vmatpush3.bf16.msra.mxu0 %v8282_v39 }
 0x29f   : > { %7593 = vmatpush3.bf16.msra.mxu1 %v8283_v40  ;;  %7572 = vmatprep.subr.bf16.mxu0 %v8284_v41 }
 0x2a0   : > { %7594 = vmatprep.subr.bf16.mxu1 %v8285_v42 }
 0x2a2   : > { %7573 = vmatpush3.bf16.msra.mxu0 %v8286_v43 }
 0x2a3   : > { %7595 = vmatpush3.bf16.msra.mxu1 %v8287_v45  ;;  %7574 = vmatprep.subr.bf16.mxu0 %v8288_v51  ;;  %v8307_v51 = vld [vmem:[#allocation8 + $0x18] sm:$0xff]  }
 0x2a4   : > { %v7272_v44 = vpop.f32.mrb[32].mxu0  ;;  %7596 = vmatprep.subr.bf16.mxu1 %v8289_v53  ;;  %v8309_v53 = vld [vmem:[#allocation8 + $0x28] sm:$0xff]  }
 0x2a5   : > { %v7294_v46 = vpop.f32.mrb[32].mxu1  ;;  %v7273_v47 = vpop.f32.mrb[33].mxu0 }
 0x2a6   : > { %v7295_v48 = vpop.f32.mrb[33].mxu1  ;;  %v7274_v49 = vadd.f32 %v7273_v47, %v7272_v44  ;;  %v7275_v52 = vpop.f32.mrb[34].mxu0  ;;  %7575 = vmatpush3.bf16.msra.mxu0 %v8290_v56 }
 0x2a7   : > { %v7296_v50 = vadd.f32 %v7295_v48, %v7294_v46  ;;  %v7297_v54 = vpop.f32.mrb[34].mxu1  ;;  %v7276_v57 = vpop.f32.mrb[35].mxu0  ;;  %7597 = vmatpush3.bf16.msra.mxu1 %v8291_v58  ;;  %7576 = vmatprep.subr.bf16.mxu0 %v8292_v61  ;;  %v8308_v52 = vld [vmem:[#allocation8 + $0x20] sm:$0xff]  }
 0x2a8   : > { %v5385_v55 = vadd.f32 %v7274_v49, %v8914_v11  ;;  %v7298_v59 = vpop.f32.mrb[35].mxu1  ;;  %7598 = vmatprep.subr.bf16.mxu1 %v8293_v62  ;;  %v8306_v49 = vld [vmem:[#allocation8 + $0x10] sm:$0xff]  }
 0x2a9   : > { %v8310_v54 = vld [vmem:[#allocation8 + $0x30] sm:$0xff]  }
 0x2aa   : > { %v5425_v60 = vadd.f32 %v7296_v50, %v5385_v55  ;;  %7577 = vmatpush3.bf16.msra.mxu0 %v8294_v63  ;;  %v8311_v55 = vld [vmem:[#allocation8 + $0x38] sm:$0xff]  }
 0x2ab   : > { %7599 = vmatpush3.bf16.msra.mxu1 %v8295_v0  ;;  %7578 = vmatprep.subr.bf16.mxu0 %v8296_v1 }
 0x2ac   : > { %7600 = vmatprep.subr.bf16.mxu1 %v8297_v2 }
 0x2ae   : > { %7579 = vmatpush3.bf16.msra.mxu0 %v8298_v3 }
 0x2af   : > { %7601 = vmatpush3.bf16.msra.mxu1 %v8299_v4  ;;  %7617 = vmatprep.subr.bf16.mxu0 %v8577_v36 }
 0x2b1   : > { %5943 = vmatmul.mubr.bf16.vlgmr.msra.gmra.mrb[60].mxu0 %v6372_v7 }
 0x2b2   : > { %5983 = vmatmul.mubr.bf16.vlgmr.msra.gmra.mrb[60].mxu1 %v6374_v9  ;;  %7618 = vmatpush3.bf16.msra.mxu0 %v8304_v35 }
 0x2b3   : > { %7619 = vmatprep.subr.bf16.mxu0 %v8577_v36  ;;  %7633 = vmatprep.mubr.msk.bf16.mxu0 %vm8578_vm0, %v8577_v36 }
 0x2b6   : > { %7620 = vmatpush3.bf16.msra.mxu0 %v8305_v37 }
 0x2b7   : > { %7621 = vmatprep.subr.bf16.mxu0 %v8577_v36 }
 0x2ba   : > { %7622 = vmatpush3.bf16.msra.mxu0 %v8306_v49 }
 0x2bb   : > { %7623 = vmatprep.subr.bf16.mxu0 %v8577_v36 }
 0x2be   : > { %7624 = vmatpush3.bf16.msra.mxu0 %v8307_v51 }
 0x2bf   : > { %7625 = vmatprep.subr.bf16.mxu0 %v8577_v36 }
 0x2c2   : > { %7626 = vmatpush3.bf16.msra.mxu0 %v8308_v52 }
 0x2c3   : > { %7627 = vmatprep.subr.bf16.mxu0 %v8577_v36 }
 0x2c4   : > { %v7316_v11 = vpop.f32.mrb[36].mxu0 }
 0x2c5   : > { %v7338_v12 = vpop.f32.mrb[36].mxu1  ;;  %v7317_v13 = vpop.f32.mrb[37].mxu0 }
 0x2c6   : > { %v7339_v14 = vpop.f32.mrb[37].mxu1  ;;  %v7318_v15 = vadd.f32 %v7317_v13, %v7316_v11  ;;  %v7319_v17 = vpop.f32.mrb[38].mxu0  ;;  %7628 = vmatpush3.bf16.msra.mxu0 %v8309_v53 }
 0x2c7   : > { %v7340_v16 = vadd.f32 %v7339_v14, %v7338_v12  ;;  %v7341_v18 = vpop.f32.mrb[38].mxu1  ;;  %v7320_v19 = vpop.f32.mrb[39].mxu0  ;;  %7629 = vmatprep.subr.bf16.mxu0 %v8577_v36 }
 0x2c8   : > { %v7342_v20 = vpop.f32.mrb[39].mxu1  ;;  %v5465_v21 = vadd.f32 %v7318_v15, %v5425_v60 }
 0x2ca   : > { %v5505_v22 = vadd.f32 %v7340_v16, %v5465_v21  ;;  %7630 = vmatpush3.bf16.msra.mxu0 %v8310_v54 }
 0x2cb   : > { %7631 = vmatprep.subr.bf16.mxu0 %v8577_v36 }
 0x2ce   : > { %7632 = vmatpush3.bf16.msra.mxu0 %v8311_v55 }
 0x2e4   : > { %v7360_v23 = vpop.f32.mrb[40].mxu0 }
 0x2e5   : > { %v7382_v24 = vpop.f32.mrb[40].mxu1  ;;  %v7361_v25 = vpop.f32.mrb[41].mxu0 }
 0x2e6   : > { %v7362_v26 = vadd.f32 %v7361_v25, %v7360_v23  ;;  %v7383_v27 = vpop.f32.mrb[41].mxu1  ;;  %v7363_v28 = vpop.f32.mrb[42].mxu0 }
 0x2e7   : > { %v7384_v29 = vadd.f32 %v7383_v27, %v7382_v24  ;;  %v7385_v30 = vpop.f32.mrb[42].mxu1  ;;  %v7364_v31 = vpop.f32.mrb[43].mxu0 }
 0x2e8   : > { %v5545_v32 = vadd.f32 %v7362_v26, %v5505_v22  ;;  %v7386_v33 = vpop.f32.mrb[43].mxu1 }
 0x2ea   : > { %v5585_v34 = vadd.f32 %v7384_v29, %v5545_v32 }
 0x304   : > { %v7404_v38 = vpop.f32.mrb[44].mxu0 }
 0x305   : > { %v7426_v39 = vpop.f32.mrb[44].mxu1  ;;  %v7405_v40 = vpop.f32.mrb[45].mxu0 }
 0x306   : > { %v7406_v41 = vadd.f32 %v7405_v40, %v7404_v38  ;;  %v7427_v42 = vpop.f32.mrb[45].mxu1  ;;  %v7407_v43 = vpop.f32.mrb[46].mxu0  ;;  %v5991_v40 = vld [vmem:[%s306_s30] sm:$0xff] }
 0x307   : > { %v7428_v44 = vadd.f32 %v7427_v42, %v7426_v39  ;;  %v7429_v45 = vpop.f32.mrb[46].mxu1  ;;  %v7408_v46 = vpop.f32.mrb[47].mxu0 }
 0x308   : > { %v5625_v47 = vadd.f32 %v7406_v41, %v5585_v34  ;;  %v7430_v48 = vpop.f32.mrb[47].mxu1 }
 0x30a   : > { %v5665_v50 = vadd.f32 %v7428_v44, %v5625_v47 }
 0x324   : > { %v7448_v56 = vpop.f32.mrb[48].mxu0 }
 0x325   : > { %v7470_v57 = vpop.f32.mrb[48].mxu1  ;;  %v7449_v58 = vpop.f32.mrb[49].mxu0 }
 0x326   : > { %v7450_v59 = vadd.f32 %v7449_v58, %v7448_v56  ;;  %v7471_v60 = vpop.f32.mrb[49].mxu1  ;;  %v7451_v61 = vpop.f32.mrb[50].mxu0 }
 0x327   : > { %v7472_v62 = vadd.f32 %v7471_v60, %v7470_v57  ;;  %v7473_v63 = vpop.f32.mrb[50].mxu1  ;;  %v7452_v0 = vpop.f32.mrb[51].mxu0 }
 0x328   : > { %v5705_v1 = vadd.f32 %v7450_v59, %v5665_v50  ;;  %v7474_v2 = vpop.f32.mrb[51].mxu1 }
 0x32a   : > { %v5745_v3 = vadd.f32 %v7472_v62, %v5705_v1 }
 0x344   : > { %v7492_v4 = vpop.f32.mrb[52].mxu0 }
 0x345   : > { %v7514_v5 = vpop.f32.mrb[52].mxu1  ;;  %v7493_v6 = vpop.f32.mrb[53].mxu0 }
 0x346   : > { %v7515_v7 = vpop.f32.mrb[53].mxu1  ;;  %v7494_v8 = vadd.f32 %v7493_v6, %v7492_v4  ;;  %v7495_v10 = vpop.f32.mrb[54].mxu0 }
 0x347   : > { %v7516_v9 = vadd.f32 %v7515_v7, %v7514_v5  ;;  %v7517_v11 = vpop.f32.mrb[54].mxu1  ;;  %v7496_v12 = vpop.f32.mrb[55].mxu0 }
 0x348   : > { %v7518_v13 = vpop.f32.mrb[55].mxu1  ;;  %v5785_v14 = vadd.f32 %v7494_v8, %v5745_v3 }
 0x34a   : > { %v5825_v15 = vadd.f32 %v7516_v9, %v5785_v14 }
 0x364   : > { %v7536_v16 = vpop.f32.mrb[56].mxu0 }
 0x365   : > { %v7558_v17 = vpop.f32.mrb[56].mxu1  ;;  %v7537_v18 = vpop.f32.mrb[57].mxu0 }
 0x366   : > { %v7538_v19 = vadd.f32 %v7537_v18, %v7536_v16  ;;  %v7559_v20 = vpop.f32.mrb[57].mxu1  ;;  %v7539_v21 = vpop.f32.mrb[58].mxu0 }
 0x367   : > { %v7560_v22 = vadd.f32 %v7559_v20, %v7558_v17  ;;  %v7561_v23 = vpop.f32.mrb[58].mxu1  ;;  %v7540_v24 = vpop.f32.mrb[59].mxu0 }
 0x368   : > { %v5865_v25 = vadd.f32 %v7538_v19, %v5825_v15  ;;  %v7562_v26 = vpop.f32.mrb[59].mxu1 }
 0x36a   : > { %v5905_v27 = vadd.f32 %v7560_v22, %v5865_v25 }
 0x384   : > { %v7580_v28 = vpop.f32.mrb[60].mxu0 }
 0x385   : > { %v7602_v29 = vpop.f32.mrb[60].mxu1  ;;  %v7581_v30 = vpop.f32.mrb[61].mxu0 }
 0x386   : > { %v7582_v31 = vadd.f32 %v7581_v30, %v7580_v28  ;;  %v7603_v32 = vpop.f32.mrb[61].mxu1  ;;  %v7583_v33 = vpop.f32.mrb[62].mxu0 }
 0x387   : > { %v7604_v34 = vadd.f32 %v7603_v32, %v7602_v29  ;;  %v7605_v35 = vpop.f32.mrb[62].mxu1  ;;  %v7584_v36 = vpop.f32.mrb[63].mxu0 }
 0x388   : > { %v5945_v37 = vadd.f32 %v7582_v31, %v5905_v27  ;;  %v7606_v38 = vpop.f32.mrb[63].mxu1 }
 0x38a   : > { %v5985_v39 = vadd.f32 %v7604_v34, %v5945_v37 }
 0x38c   : > { %v5990_v41 = vmul.f32 0.015625, %v5985_v39 }
 0x38e   : > { %v5992_v42 = vmul.f32 %v5991_v40, %v5990_v41 }
 0x390   : > { %8312 = vtanh.f32 %v5992_v42 }
 0x39a   : > { %v8313_v43 = vpop.eup %8312 }
 0x39b   : > { %v5995_v44 = vpack.c.bf16 %v8313_v43, %v8313_v43  ;;  %5994 = vst [vmem:[%s349_s27] sm:$0xff] %v8313_v43 }
 0x39d   : > { %7634 = vmatmul.mubr.bf16.vlgmr.msra.gmra.mrb[64].mxu0 %v5995_v44 }
 0x39e   : > { %8471 = shalt.err (!%p8468_p6)
}
 0x39f   : > { %s8472_s20 = scalar_lea.hbm %s8930_s16, 128  ;;  %s8476_s30 = scalar_lea.hbm %s9004_s5, 384 }
 0x3a0   : > { %p8473_p12 = scmp.ne.s32.totalorder %s8930_s16, %s8472_s20  ;;  %p8477_p9 = scmp.lt.u32.totalorder %s8930_s16, %s9004_s5 }
 0x3a1   : > { %p8478_p3 = scmp.lt.u32.totalorder %s8476_s30, %s8472_s20  ;;  %p8480_p11 = scmp.lt.u32.totalorder %s8472_s20, %s8930_s16 }
 0x3a2   : > { %p8474_p5 = pnand %p8473_p12, %p9029_p2 }
 0x3a3   : > { %p8479_p7 = por %p8478_p3, %p8477_p9 }
 0x3a4   : > { %p8475_p10 = pneg %p8474_p5 }
 0x3a5   : > { %p8481_p1 = por %p8480_p11, %p8479_p7 }
 0x3a7   : > { %p8482_p4 = pnand %p8481_p1, %p8475_p10 }
 0x3a9   : > { %8485 = shalt.err (!%p8482_p4)
}
 0x3aa   : > { %7653 = dma.vmem_to_hbm [thread:$0]  (%p9029_p2), %s6128_s11, 128, %s8930_s16, %s6109_s19   ;;  %v6888_v45 = vld [vmem:[#allocation10] ss:$0 sm:$0xff] }
 0x3ab   : > { %s356_s9 = scalar_lea.vmem [#allocation12], %s8850_s29  ;;  %s8956_s15 = scalar_lea.hbm %s9005_s6, %s6899_s12 }
 0x3ac   : > { %s6140_s8 = sshll.u32 %s356_s9, 4  ;;  %s6114_s16 = scalar_lea.sflag [#allocation13], %s8838_s2  ;;  %s8958_s8 = int_to_ptr.vmem [resolvable:$true] %s6140_s8 }
 0x3ad   : > { %s8486_s29 = scalar_lea.vmem %s8958_s8, 128  ;;  %s8580_s25 = smov [#allocation12]  }
 0x3ae   : > { %p8487_p13 = scmp.ne.s32.totalorder %s8958_s8, %s8486_s29  ;;  %s8490_s11 = sshll.u32 %s8580_s25, 4  ;;  %s8491_s11 = int_to_ptr.vmem [resolvable:$false] %s8490_s11 }
 0x3af   : > { %s8492_s19 = scalar_lea.vmem %s8491_s11, 256  ;;  %p8493_p6 = scmp.lt.s32.totalorder %s8958_s8, %s8491_s11 }
 0x3b0   : > { %p8488_p8 = pnand %p8487_p13, %p9029_p2  ;;  %p8494_p12 = scmp.lt.s32.totalorder %s8492_s19, %s8486_s29 }
 0x3b2   : > { %p8489_p0 = pneg %p8488_p8  ;;  %p8495_p5 = por %p8494_p12, %p8493_p6 }
 0x3b4   : > { %p8496_p10 = pnand %p8495_p5, %p8489_p0 }
 0x470   : > { %v6101_v46 = vpop.f32.mrb[64].mxu0 }
 0x471   : > { %v6102_v47 = vadd.f32 %v6888_v45, %v6101_v46  ;;  %v7635_v48 = vpop.f32.mrb[65].mxu0 }
 0x472   : > { %v6104_v49 = vpop.f32.mrb[66].mxu0 }
 0x473   : > { %6107 = vst [vmem:[%s356_s9] sm:$0xff] %v6102_v47  ;;  %v7636_v50 = vpop.f32.mrb[67].mxu0 }
 0x474   : > { %8499 = shalt.err (!%p8496_p10)
}
 0x475   : > { %s8500_s2 = scalar_lea.hbm %s8956_s15, 128  ;;  %s8504_s0 = scalar_lea.hbm %s9005_s6, 384 }
 0x476   : > { %p8501_p9 = scmp.ne.s32.totalorder %s8956_s15, %s8500_s2  ;;  %p8505_p11 = scmp.lt.u32.totalorder %s8956_s15, %s9005_s6 }
 0x477   : > { %p8506_p1 = scmp.lt.u32.totalorder %s8504_s0, %s8500_s2  ;;  %p8508_p13 = scmp.lt.u32.totalorder %s8500_s2, %s8956_s15 }
 0x478   : > { %p8502_p3 = pnand %p8501_p9, %p9029_p2 }
 0x479   : > { %p8507_p4 = por %p8506_p1, %p8505_p11 }
 0x47a   : > { %p8503_p7 = pneg %p8502_p3 }
 0x47b   : > { %p8509_p8 = por %p8508_p13, %p8507_p4 }
 0x47d   : > { %p8510_p0 = pnand %p8509_p8, %p8503_p7 }
 0x47f   : > { %8513 = shalt.err (!%p8510_p0)
}
 0x480   : > { %7654 = dma.vmem_to_hbm [thread:$0]  (%p9029_p2), %s8958_s8, 128, %s8956_s15, %s6114_s16  }
 0x481 PF: > { %p7688_p6 = scmp.ge.s32.totalorder %s8568_s24, 2  ;;  %s6152_s27 = sand.u32 1, %s8556_s21  }
 0x482   : > { %p9030_p12 = scmp.ne.s32.totalorder %s9013_s28, 0  ;;  %s6153_s7 = scalar_lea.sflag [#allocation4], %s6152_s27 }
 0x484   : > { %p7675_p5 = pnand %p7688_p6, %p9030_p12 }
 0x486   : > { %8547 = dma.done.wait (!%p7675_p5), %s6153_s7, 128  }
 0x487   : > { %8549 = vsyncadd (!%p7675_p5), %s6153_s7, 4294967168  ;;  %s6162_s9 = scalar_lea.sflag [#allocation13], %s6152_s27 }
 0x488   : > { %8551 = dma.done.wait (!%p7675_p5), %s6162_s9, 128  }
 0x489   : > { %8553 = vsyncadd (!%p7675_p5), %s6162_s9, 4294967168  ;;  %p27_p2 = scmp.ge.s32.totalorder %s8746_s18, 5   ;;  %s9031_s21 = smov %s8560_s22 }
 0x48a   : > { %s9032_s22 = smov %s8564_s23  ;;  %s9033_s23 = smov %s8756_s13 }
 0x48b   : > { %s9034_s24 = smov %s8746_s18  ;;  %29 = sbr.rel (!%p27_p2) target bundleno = 13 (0xd), region = 127 }
 0x492   :  { %6167 = vsyncpa [#allocation3], 1 }
 0x493   :  { %6169 = vsyncpa [#allocation3 + $0x1], 1 }
 0x494   :  { %6170 = vsyncpa [#allocation6], 1 }
 0x495   :  { %6172 = vsyncpa [#allocation6 + $0x1], 1 }
 0x496   :  { %6173 = vsyncpa [#allocation9], 1 }
 0x497   :  { %6174 = vsyncpa [#allocation4], 1 }
 0x498   :  { %6176 = vsyncpa [#allocation4 + $0x1], 1 }
 0x499   :  { %6177 = vsyncpa [#allocation13], 1 }
 0x49a   :  { %6179 = vsyncpa [#allocation13 + $0x1], 1 }

</bundles_post_ra>
